<compile_context>
chip_gen: v7x
topology: tpu7x:2x2x1
jax: 0.10.0
libtpu: 0.0.40
codegen_flags: <defaults>
</compile_context>

<pallas_src>
import jax
import jax.numpy as jnp
import numpy as np
from jax import lax
from jax.experimental import pallas as pl
from jax.experimental.pallas import tpu as pltpu

# ----- small synthetic config (shapes implied by Decoder.__init__) -----
VOCAB = 50          # config.vocab_size
EMB = 16            # config.emb_dim
HIDDEN = 32         # config.hidden_dim
BATCH = 2
TK = 8              # encoder length t_k
N_EXTRA = 4         # width of extra_zeros (OOV slots)
VOCAB_EXT = VOCAB + N_EXTRA
RAND_UNIF_MAG = 0.1     # config.rand_unif_init_mag (synthetic)
TRUNC_NORM_STD = 0.1    # config.trunc_norm_init_std (synthetic)


def _fullspec(shape):
    """BlockSpec covering the whole array (grid=(1,))."""
    if len(shape) == 2:
        return pl.BlockSpec(shape, lambda i: (0, 0))
    if len(shape) == 3:
        return pl.BlockSpec(shape, lambda i: (0, 0, 0))
    raise ValueError(f"unsupported rank: {shape}")


# ------------------------- fused decoder-step kernel -------------------------
def _decoder_step_kernel(
        # data
        y_ref, emb_w_ref, h_ref, c_ref, enc_out_ref, enc_feat_ref,
        mask_ref, ctx_prev_ref, cov_ref, ext_ids_ref,
        # x_context (split: c_t_1 part / embedding part)
        w_xc_c_ref, w_xc_e_ref, b_xc_ref,
        # LSTM cell
        w_ih_ref, w_hh_ref, b_lstm_ref,
        # attention (decode_proj split into h/c parts, W_c, v)
        w_dp_h_ref, w_dp_c_ref, b_dp_ref, w_c_ref, v_ref,
        # pointer-gen linear (split into c_t / h / c / x parts)
        w_pg_ct_ref, w_pg_h_ref, w_pg_c_ref, w_pg_x_ref, b_pg_ref,
        # output projections (out1 split into h / c_t parts, out2 ext-padded)
        w_o1_h_ref, w_o1_ct_ref, b_o1_ref, w_o2_ref, b_o2_ref,
        # outputs
        final_ref, h_out_ref, c_out_ref, ctx_out_ref,
        attn_out_ref, pgen_out_ref, cov_out_ref):
    H = HIDDEN
    f32 = jnp.float32

    # --- embedding lookup via one-hot matmul (gather-free) ---
    y = y_ref[...]                                              # (B, 1) int32
    B = y.shape[0]
    vocab_iota = lax.broadcasted_iota(jnp.int32, (B, VOCAB), 1)
    y_onehot = (y == vocab_iota).astype(f32)                    # (B, V)
    emb = jnp.dot(y_onehot, emb_w_ref[...], preferred_element_type=f32)  # (B, E)

    # --- x = x_context(cat(c_t_1, y_embd))  (concat folded into split matmuls)
    x = (jnp.dot(ctx_prev_ref[...], w_xc_c_ref[...], preferred_element_type=f32)
         + jnp.dot(emb, w_xc_e_ref[...], preferred_element_type=f32)
         + b_xc_ref[...])                                       # (B, E)

    # --- single LSTM cell step (PyTorch gate order i, f, g, o) ---
    h_prev = h_ref[...]
    c_prev = c_ref[...]
    gates = (jnp.dot(x, w_ih_ref[...], preferred_element_type=f32)
             + jnp.dot(h_prev, w_hh_ref[...], preferred_element_type=f32)
             + b_lstm_ref[...])                                 # (B, 4H)
    sig = jax.nn.sigmoid(gates)        # full-vreg activations, slice after
    th = jnp.tanh(gates)
    i_g = sig[:, 0 * H:1 * H]
    f_g = sig[:, 1 * H:2 * H]
    g_g = th[:, 2 * H:3 * H]
    o_g = sig[:, 3 * H:4 * H]
    c_state = f_g * c_prev + i_g * g_g
    h_t = o_g * jnp.tanh(c_state)                               # (B, H)

    # --- attention (s_t_hat = cat(h_t, c_state) folded into split matmuls) ---
    dec_fea = (jnp.dot(h_t, w_dp_h_ref[...], preferred_element_type=f32)
               + jnp.dot(c_state, w_dp_c_ref[...], preferred_element_type=f32)
               + b_dp_ref[...])                                 # (B, 2H)
    cov = cov_ref[...]                                          # (B, TK)
    att = (enc_feat_ref[...]
           + dec_fea[:, None, :]
           + cov[:, :, None] * w_c_ref[...][None])              # (B, TK, 2H)
    e = jnp.tanh(att)
    scores = jnp.sum(e * v_ref[...][None], axis=-1)             # (B, TK)

    # masked softmax + renormalization (matches F.softmax * mask / sum)
    smax = jnp.max(scores, axis=-1, keepdims=True)
    sexp = jnp.exp(scores - smax)
    sm = sexp / jnp.sum(sexp, axis=-1, keepdims=True)
    attn_masked = sm * mask_ref[...]
    attn = attn_masked / jnp.sum(attn_masked, axis=-1, keepdims=True)  # (B, TK)

    # context vector c_t = attn @ encoder_outputs (per batch element)
    c_t = jnp.sum(attn[:, :, None] * enc_out_ref[...], axis=1)  # (B, 2H)
    cov_next = cov + attn

    # --- pointer-generation probability ---
    p_lin = (jnp.sum(c_t * w_pg_ct_ref[...], axis=-1, keepdims=True)
             + jnp.sum(h_t * w_pg_h_ref[...], axis=-1, keepdims=True)
             + jnp.sum(c_state * w_pg_c_ref[...], axis=-1, keepdims=True)
             + jnp.sum(x * w_pg_x_ref[...], axis=-1, keepdims=True)
             + b_pg_ref[...])
    p_gen = jax.nn.sigmoid(p_lin)                               # (B, 1)

    # --- vocab distribution: out2(out1(cat(lstm_out, c_t))) + softmax ---
    o1 = (jnp.dot(h_t, w_o1_h_ref[...], preferred_element_type=f32)
          + jnp.dot(c_t, w_o1_ct_ref[...], preferred_element_type=f32)
          + b_o1_ref[...])                                      # (B, H)
    # out2 weights/bias are padded to VOCAB_EXT (zero weight, -1e30 bias) so
    # softmax over the extended width == softmax(V) || zeros exactly.
    logits = jnp.dot(o1, w_o2_ref[...], preferred_element_type=f32) + b_o2_ref[...]
    lmax = jnp.max(logits, axis=-1, keepdims=True)
    lexp = jnp.exp(logits - lmax)
    vocab_dist = lexp / jnp.sum(lexp, axis=-1, keepdims=True)   # (B, Vext)

    vocab_scaled = p_gen * vocab_dist                           # (B, Vext)
    attn_scaled = (1.0 - p_gen) * attn                          # (B, TK)

    # scatter_add over the extended vocab via one-hot multiply + reduce
    ext_ids = ext_ids_ref[...]                                  # (B, TK) int32
    ext_iota = lax.broadcasted_iota(
        jnp.int32, (ext_ids.shape[0], ext_ids.shape[1], VOCAB_EXT), 2)
    onehot = (ext_ids[:, :, None] == ext_iota).astype(f32)      # (B, TK, Vext)
    scat = jnp.sum(attn_scaled[:, :, None] * onehot, axis=1)    # (B, Vext)

    # single lane-dense store of the final distribution
    final_ref[...] = vocab_scaled + scat
    h_out_ref[...] = h_t
    c_out_ref[...] = c_state
    ctx_out_ref[...] = c_t
    attn_out_ref[...] = attn
    pgen_out_ref[...] = p_gen
    cov_out_ref[...] = cov_next


# ------------------------------- wrapper -------------------------------------
def decoder_step_pallas(y_t_1, s_t_1, encoder_outputs, encoder_feature,
                        enc_padding_mask, c_t_1, enc_batch_extend_vocab,
                        coverage, p):
    H = HIDDEN
    B, TK_, _ = encoder_outputs.shape

    # data inputs
    y_ids = y_t_1.astype(jnp.int32).reshape(B, 1)
    h_prev = s_t_1[0].reshape(B, H)
    c_prev = s_t_1[1].reshape(B, H)
    enc_feat = encoder_feature.reshape(B, TK_, 2 * H)
    ext_ids = enc_batch_extend_vocab.astype(jnp.int32)

    # weights: pre-transposed and split so no lane-concat is needed in-kernel
    w_xc_t = p["w_xc"].T                               # (2H+E, E)
    w_ih_t = p["w_ih"].T                               # (E, 4H)
    w_hh_t = p["w_hh"].T                               # (H, 4H)
    b_lstm = (p["b_ih"] + p["b_hh"])[None, :]          # (1, 4H)
    w_dp_t = p["w_dp"].T                               # (2H, 2H)
    w_o1_t = p["w_o1"].T                               # (3H, H)
    w_o2_ext = jnp.concatenate(
        [p["w_o2"].T, jnp.zeros((H, N_EXTRA), jnp.float32)], axis=1)  # (H, Vext)
    b_o2_ext = jnp.concatenate(
        [p["b_o2"], jnp.full((N_EXTRA,), -1e30, jnp.float32)])[None, :]

    args = [
        y_ids, p["emb_w"], h_prev, c_prev, encoder_outputs, enc_feat,
        enc_padding_mask.astype(jnp.float32), c_t_1, coverage, ext_ids,
        w_xc_t[:2 * H], w_xc_t[2 * H:], p["b_xc"][None, :],
        w_ih_t, w_hh_t, b_lstm,
        w_dp_t[:H], w_dp_t[H:], p["b_dp"][None, :],
        p["w_c"][:, 0][None, :], p["w_v"],
        p["w_pg"][:, :2 * H], p["w_pg"][:, 2 * H:3 * H],
        p["w_pg"][:, 3 * H:4 * H], p["w_pg"][:, 4 * H:], p["b_pg"][None, :],
        w_o1_t[:H], w_o1_t[H:], p["b_o1"][None, :],
        w_o2_ext, b_o2_ext,
    ]

    out_shape = [
        jax.ShapeDtypeStruct((B, VOCAB_EXT), jnp.float32),   # final_dist
        jax.ShapeDtypeStruct((B, H), jnp.float32),           # h_t
        jax.ShapeDtypeStruct((B, H), jnp.float32),           # c_t (cell state)
        jax.ShapeDtypeStruct((B, 2 * H), jnp.float32),       # context c_t
        jax.ShapeDtypeStruct((B, TK_), jnp.float32),         # attn_dist
        jax.ShapeDtypeStruct((B, 1), jnp.float32),           # p_gen
        jax.ShapeDtypeStruct((B, TK_), jnp.float32),         # coverage_next
    ]

    outs = pl.pallas_call(
        _decoder_step_kernel,
        out_shape=out_shape,
        grid=(1,),
        in_specs=[_fullspec(a.shape) for a in args],
        out_specs=[_fullspec(s.shape) for s in out_shape],
        compiler_params=pltpu.CompilerParams(
            dimension_semantics=("arbitrary",)),
    )(*args)

    final, h_t, c_state, c_t, attn, p_gen, cov_next = outs
    return final, (h_t[None], c_state[None]), c_t, attn, p_gen, cov_next


# ---------------------------- plain-JAX reference ----------------------------
def decoder_reference(y_t_1, s_t_1, encoder_outputs, encoder_feature,
                      enc_padding_mask, c_t_1, enc_batch_extend_vocab,
                      coverage, p):
    H = HIDDEN
    B, TK_, _ = encoder_outputs.shape
    h_prev = s_t_1[0].reshape(B, H)
    c_prev = s_t_1[1].reshape(B, H)

    emb = p["emb_w"][y_t_1]                                     # (B, E)
    x = jnp.concatenate([c_t_1, emb], 1) @ p["w_xc"].T + p["b_xc"]

    gates = x @ p["w_ih"].T + p["b_ih"] + h_prev @ p["w_hh"].T + p["b_hh"]
    i = jax.nn.sigmoid(gates[:, :H])
    f = jax.nn.sigmoid(gates[:, H:2 * H])
    g = jnp.tanh(gates[:, 2 * H:3 * H])
    o = jax.nn.sigmoid(gates[:, 3 * H:])
    c_state = f * c_prev + i * g
    h_t = o * jnp.tanh(c_state)

    s_t_hat = jnp.concatenate([h_t, c_state], 1)
    dec_fea = s_t_hat @ p["w_dp"].T + p["b_dp"]
    att = (encoder_feature.reshape(B, TK_, 2 * H)
           + dec_fea[:, None, :]
           + coverage[:, :, None] * p["w_c"][:, 0][None, None, :])
    e = jnp.tanh(att)
    scores = (e.reshape(-1, 2 * H) @ p["w_v"].T).reshape(B, TK_)
    sm = jax.nn.softmax(scores, axis=1) * enc_padding_mask
    attn = sm / jnp.sum(sm, axis=1, keepdims=True)
    c_t = jnp.einsum("bk,bkn->bn", attn, encoder_outputs)
    cov_next = coverage + attn

    p_gen_in = jnp.concatenate([c_t, s_t_hat, x], 1)
    p_gen = jax.nn.sigmoid(p_gen_in @ p["w_pg"].T + p["b_pg"])

    out = jnp.concatenate([h_t, c_t], 1) @ p["w_o1"].T + p["b_o1"]
    logits = out @ p["w_o2"].T + p["b_o2"]
    vocab_dist = jax.nn.softmax(logits, axis=1)
    vocab_ = p_gen * vocab_dist
    attn_ = (1.0 - p_gen) * attn
    vocab_ext = jnp.concatenate(
        [vocab_, jnp.zeros((B, N_EXTRA), jnp.float32)], 1)
    final = vocab_ext.at[jnp.arange(B)[:, None],
                         enc_batch_extend_vocab].add(attn_)
    return final, (h_t, c_state), c_t, attn, p_gen, cov_next


# ----------------------------------- main ------------------------------------
if __name__ == "__main__":
    key = jax.random.PRNGKey(0)
    ks = jax.random.split(key, 24)
    H, E, V = HIDDEN, EMB, VOCAB

    def unif(k, shape):   # init_lstm_wt: uniform(-mag, mag)
        return jax.random.uniform(k, shape, jnp.float32,
                                  -RAND_UNIF_MAG, RAND_UNIF_MAG)

    def nrm(k, shape):    # init_wt_normal / init_linear_wt (synthetic)
        return TRUNC_NORM_STD * jax.random.normal(k, shape, jnp.float32)

    lstm_bias = jnp.zeros((4 * H,), jnp.float32).at[H:2 * H].set(1.0)

    params = dict(
        emb_w=nrm(ks[0], (V, E)),
        w_xc=nrm(ks[1], (E, 2 * H + E)), b_xc=nrm(ks[2], (E,)),
        w_ih=unif(ks[3], (4 * H, E)), w_hh=unif(ks[4], (4 * H, H)),
        b_ih=lstm_bias, b_hh=lstm_bias,
        w_dp=nrm(ks[5], (2 * H, 2 * H)), b_dp=nrm(ks[6], (2 * H,)),
        w_c=nrm(ks[7], (2 * H, 1)),
        w_v=nrm(ks[8], (1, 2 * H)),
        w_pg=nrm(ks[9], (1, 4 * H + E)), b_pg=nrm(ks[10], (1,)),
        w_o1=nrm(ks[11], (H, 3 * H)), b_o1=nrm(ks[12], (H,)),
        w_o2=nrm(ks[13], (V, H)), b_o2=nrm(ks[14], (V,)),
    )

    y_t_1 = jax.random.randint(ks[15], (BATCH,), 0, V, dtype=jnp.int32)
    h0 = nrm(ks[16], (1, BATCH, H))
    c0 = nrm(ks[17], (1, BATCH, H))
    enc_out = nrm(ks[18], (BATCH, TK, 2 * H))
    enc_feat = nrm(ks[19], (BATCH * TK, 2 * H))
    enc_mask = jnp.array([[1.0] * TK,
                          [1.0] * 5 + [0.0] * (TK - 5)], jnp.float32)
    c_t_1 = nrm(ks[20], (BATCH, 2 * H))
    ext_ids = jax.random.randint(ks[21], (BATCH, TK), 0, VOCAB_EXT,
                                 dtype=jnp.int32)
    coverage = jax.random.uniform(ks[22], (BATCH, TK), jnp.float32, 0.0, 0.5)

    outs = decoder_step_pallas(y_t_1, (h0, c0), enc_out, enc_feat,
                               enc_mask, c_t_1, ext_ids, coverage, params)
    jax.block_until_ready(outs)

    refs = decoder_reference(y_t_1, (h0, c0), enc_out, enc_feat,
                             enc_mask, c_t_1, ext_ids, coverage, params)

    (f_k, (h_k, ck_k), ct_k, a_k, pg_k, cov_k) = outs
    (f_r, (h_r, ck_r), ct_r, a_r, pg_r, cov_r) = refs
    for got, want in [(f_k, f_r), (h_k[0], h_r), (ck_k[0], ck_r),
                      (ct_k, ct_r), (a_k, a_r), (pg_k, pg_r), (cov_k, cov_r)]:
        np.testing.assert_allclose(np.asarray(got), np.asarray(want),
                                   rtol=2e-3, atol=2e-3)

    print("KERNEL_OK")
</pallas_src>

<mosaic_0001>
module attributes {stable_mosaic.version = 11 : i64} {
  func.func @_decoder_step_kernel(%arg0: i32, %arg1: memref<2x1xi32, #tpu.memory_space<vmem>>, %arg2: memref<50x16xf32, #tpu.memory_space<vmem>>, %arg3: memref<2x32xf32, #tpu.memory_space<vmem>>, %arg4: memref<2x32xf32, #tpu.memory_space<vmem>>, %arg5: memref<2x8x64xf32, #tpu.memory_space<vmem>>, %arg6: memref<2x8x64xf32, #tpu.memory_space<vmem>>, %arg7: memref<2x8xf32, #tpu.memory_space<vmem>>, %arg8: memref<2x64xf32, #tpu.memory_space<vmem>>, %arg9: memref<2x8xf32, #tpu.memory_space<vmem>>, %arg10: memref<2x8xi32, #tpu.memory_space<vmem>>, %arg11: memref<64x16xf32, #tpu.memory_space<vmem>>, %arg12: memref<16x16xf32, #tpu.memory_space<vmem>>, %arg13: memref<1x16xf32, #tpu.memory_space<vmem>>, %arg14: memref<16x128xf32, #tpu.memory_space<vmem>>, %arg15: memref<32x128xf32, #tpu.memory_space<vmem>>, %arg16: memref<1x128xf32, #tpu.memory_space<vmem>>, %arg17: memref<32x64xf32, #tpu.memory_space<vmem>>, %arg18: memref<32x64xf32, #tpu.memory_space<vmem>>, %arg19: memref<1x64xf32, #tpu.memory_space<vmem>>, %arg20: memref<1x64xf32, #tpu.memory_space<vmem>>, %arg21: memref<1x64xf32, #tpu.memory_space<vmem>>, %arg22: memref<1x64xf32, #tpu.memory_space<vmem>>, %arg23: memref<1x32xf32, #tpu.memory_space<vmem>>, %arg24: memref<1x32xf32, #tpu.memory_space<vmem>>, %arg25: memref<1x16xf32, #tpu.memory_space<vmem>>, %arg26: memref<1x1xf32, #tpu.memory_space<vmem>>, %arg27: memref<32x32xf32, #tpu.memory_space<vmem>>, %arg28: memref<64x32xf32, #tpu.memory_space<vmem>>, %arg29: memref<1x32xf32, #tpu.memory_space<vmem>>, %arg30: memref<32x54xf32, #tpu.memory_space<vmem>>, %arg31: memref<1x54xf32, #tpu.memory_space<vmem>>, %arg32: memref<2x54xf32, #tpu.memory_space<vmem>>, %arg33: memref<2x32xf32, #tpu.memory_space<vmem>>, %arg34: memref<2x32xf32, #tpu.memory_space<vmem>>, %arg35: memref<2x64xf32, #tpu.memory_space<vmem>>, %arg36: memref<2x8xf32, #tpu.memory_space<vmem>>, %arg37: memref<2x1xf32, #tpu.memory_space<vmem>>, %arg38: memref<2x8xf32, #tpu.memory_space<vmem>>) attributes {dimension_semantics = [#tpu.dimension_semantics<arbitrary>], iteration_bounds = array<i64: 1>, scalar_prefetch = 0 : i64, scratch_operands = 0 : i64, tpu.core_type = #tpu.core_type<tc>, window_params = [{pipeline_mode = #tpu.pipeline_mode<synchronous>, transform_indices = @transform_0, window_bounds = array<i64: 2, 1>}, {pipeline_mode = #tpu.pipeline_mode<synchronous>, transform_indices = @transform_1, window_bounds = array<i64: 50, 16>}, {pipeline_mode = #tpu.pipeline_mode<synchronous>, transform_indices = @transform_2, window_bounds = array<i64: 2, 32>}, {pipeline_mode = #tpu.pipeline_mode<synchronous>, transform_indices = @transform_3, window_bounds = array<i64: 2, 32>}, {pipeline_mode = #tpu.pipeline_mode<synchronous>, transform_indices = @transform_4, window_bounds = array<i64: 2, 8, 64>}, {pipeline_mode = #tpu.pipeline_mode<synchronous>, transform_indices = @transform_5, window_bounds = array<i64: 2, 8, 64>}, {pipeline_mode = #tpu.pipeline_mode<synchronous>, transform_indices = @transform_6, window_bounds = array<i64: 2, 8>}, {pipeline_mode = #tpu.pipeline_mode<synchronous>, transform_indices = @transform_7, window_bounds = array<i64: 2, 64>}, {pipeline_mode = #tpu.pipeline_mode<synchronous>, transform_indices = @transform_8, window_bounds = array<i64: 2, 8>}, {pipeline_mode = #tpu.pipeline_mode<synchronous>, transform_indices = @transform_9, window_bounds = array<i64: 2, 8>}, {pipeline_mode = #tpu.pipeline_mode<synchronous>, transform_indices = @transform_10, window_bounds = array<i64: 64, 16>}, {pipeline_mode = #tpu.pipeline_mode<synchronous>, transform_indices = @transform_11, window_bounds = array<i64: 16, 16>}, {pipeline_mode = #tpu.pipeline_mode<synchronous>, transform_indices = @transform_12, window_bounds = array<i64: 1, 16>}, {pipeline_mode = #tpu.pipeline_mode<synchronous>, transform_indices = @transform_13, window_bounds = array<i64: 16, 128>}, {pipeline_mode = #tpu.pipeline_mode<synchronous>, transform_indices = @transform_14, window_bounds = array<i64: 32, 128>}, {pipeline_mode = #tpu.pipeline_mode<synchronous>, transform_indices = @transform_15, window_bounds = array<i64: 1, 128>}, {pipeline_mode = #tpu.pipeline_mode<synchronous>, transform_indices = @transform_16, window_bounds = array<i64: 32, 64>}, {pipeline_mode = #tpu.pipeline_mode<synchronous>, transform_indices = @transform_17, window_bounds = array<i64: 32, 64>}, {pipeline_mode = #tpu.pipeline_mode<synchronous>, transform_indices = @transform_18, window_bounds = array<i64: 1, 64>}, {pipeline_mode = #tpu.pipeline_mode<synchronous>, transform_indices = @transform_19, window_bounds = array<i64: 1, 64>}, {pipeline_mode = #tpu.pipeline_mode<synchronous>, transform_indices = @transform_20, window_bounds = array<i64: 1, 64>}, {pipeline_mode = #tpu.pipeline_mode<synchronous>, transform_indices = @transform_21, window_bounds = array<i64: 1, 64>}, {pipeline_mode = #tpu.pipeline_mode<synchronous>, transform_indices = @transform_22, window_bounds = array<i64: 1, 32>}, {pipeline_mode = #tpu.pipeline_mode<synchronous>, transform_indices = @transform_23, window_bounds = array<i64: 1, 32>}, {pipeline_mode = #tpu.pipeline_mode<synchronous>, transform_indices = @transform_24, window_bounds = array<i64: 1, 16>}, {pipeline_mode = #tpu.pipeline_mode<synchronous>, transform_indices = @transform_25, window_bounds = array<i64: 1, 1>}, {pipeline_mode = #tpu.pipeline_mode<synchronous>, transform_indices = @transform_26, window_bounds = array<i64: 32, 32>}, {pipeline_mode = #tpu.pipeline_mode<synchronous>, transform_indices = @transform_27, window_bounds = array<i64: 64, 32>}, {pipeline_mode = #tpu.pipeline_mode<synchronous>, transform_indices = @transform_28, window_bounds = array<i64: 1, 32>}, {pipeline_mode = #tpu.pipeline_mode<synchronous>, transform_indices = @transform_29, window_bounds = array<i64: 32, 54>}, {pipeline_mode = #tpu.pipeline_mode<synchronous>, transform_indices = @transform_30, window_bounds = array<i64: 1, 54>}, {pipeline_mode = #tpu.pipeline_mode<synchronous>, transform_indices = @transform_31, window_bounds = array<i64: 2, 54>}, {pipeline_mode = #tpu.pipeline_mode<synchronous>, transform_indices = @transform_32, window_bounds = array<i64: 2, 32>}, {pipeline_mode = #tpu.pipeline_mode<synchronous>, transform_indices = @transform_33, window_bounds = array<i64: 2, 32>}, {pipeline_mode = #tpu.pipeline_mode<synchronous>, transform_indices = @transform_34, window_bounds = array<i64: 2, 64>}, {pipeline_mode = #tpu.pipeline_mode<synchronous>, transform_indices = @transform_35, window_bounds = array<i64: 2, 8>}, {pipeline_mode = #tpu.pipeline_mode<synchronous>, transform_indices = @transform_36, window_bounds = array<i64: 2, 1>}, {pipeline_mode = #tpu.pipeline_mode<synchronous>, transform_indices = @transform_37, window_bounds = array<i64: 2, 8>}]} {
    %c0 = arith.constant 0 : index
    %c0_0 = arith.constant 0 : index
    %0 = vector.load %arg1[%c0, %c0_0] : memref<2x1xi32, #tpu.memory_space<vmem>>, vector<2x1xi32>
    %1 = tpu.iota {dimensions = array<i32: 1>} : vector<2x50xi32>
    %2 = vector.broadcast %0 : vector<2x1xi32> to vector<2x50xi32>
    %3 = arith.cmpi eq, %2, %1 : vector<2x50xi32>
    %4 = arith.extui %3 : vector<2x50xi1> to vector<2x50xi32>
    %5 = arith.sitofp %4 : vector<2x50xi32> to vector<2x50xf32>
    %c0_1 = arith.constant 0 : index
    %c0_2 = arith.constant 0 : index
    %6 = vector.load %arg2[%c0_1, %c0_2] : memref<50x16xf32, #tpu.memory_space<vmem>>, vector<50x16xf32>
    %cst = arith.constant dense<0.000000e+00> : vector<2x16xf32>
    %7 = tpu.matmul %5, %6, %cst {dimension_numbers = #tpu.dot_dimension_numbers<[1], [0], [0], [1], [0, 0, 1, 1], [], []>} : vector<2x50xf32>, vector<50x16xf32>, vector<2x16xf32> -> vector<2x16xf32>
    %c0_3 = arith.constant 0 : index
    %c0_4 = arith.constant 0 : index
    %8 = vector.load %arg8[%c0_3, %c0_4] : memref<2x64xf32, #tpu.memory_space<vmem>>, vector<2x64xf32>
    %c0_5 = arith.constant 0 : index
    %c0_6 = arith.constant 0 : index
    %9 = vector.load %arg11[%c0_5, %c0_6] : memref<64x16xf32, #tpu.memory_space<vmem>>, vector<64x16xf32>
    %cst_7 = arith.constant dense<0.000000e+00> : vector<2x16xf32>
    %10 = tpu.matmul %8, %9, %cst_7 {dimension_numbers = #tpu.dot_dimension_numbers<[1], [0], [0], [1], [0, 0, 1, 1], [], []>} : vector<2x64xf32>, vector<64x16xf32>, vector<2x16xf32> -> vector<2x16xf32>
    %c0_8 = arith.constant 0 : index
    %c0_9 = arith.constant 0 : index
    %11 = vector.load %arg12[%c0_8, %c0_9] : memref<16x16xf32, #tpu.memory_space<vmem>>, vector<16x16xf32>
    %cst_10 = arith.constant dense<0.000000e+00> : vector<2x16xf32>
    %12 = tpu.matmul %7, %11, %cst_10 {dimension_numbers = #tpu.dot_dimension_numbers<[1], [0], [0], [1], [0, 0, 1, 1], [], []>} : vector<2x16xf32>, vector<16x16xf32>, vector<2x16xf32> -> vector<2x16xf32>
    %13 = arith.addf %10, %12 : vector<2x16xf32>
    %c0_11 = arith.constant 0 : index
    %c0_12 = arith.constant 0 : index
    %14 = vector.load %arg13[%c0_11, %c0_12] : memref<1x16xf32, #tpu.memory_space<vmem>>, vector<1x16xf32>
    %15 = vector.broadcast %14 : vector<1x16xf32> to vector<2x16xf32>
    %16 = arith.addf %13, %15 : vector<2x16xf32>
    %c0_13 = arith.constant 0 : index
    %c0_14 = arith.constant 0 : index
    %17 = vector.load %arg3[%c0_13, %c0_14] : memref<2x32xf32, #tpu.memory_space<vmem>>, vector<2x32xf32>
    %c0_15 = arith.constant 0 : index
    %c0_16 = arith.constant 0 : index
    %18 = vector.load %arg4[%c0_15, %c0_16] : memref<2x32xf32, #tpu.memory_space<vmem>>, vector<2x32xf32>
    %c0_17 = arith.constant 0 : index
    %c0_18 = arith.constant 0 : index
    %19 = vector.load %arg14[%c0_17, %c0_18] : memref<16x128xf32, #tpu.memory_space<vmem>>, vector<16x128xf32>
    %cst_19 = arith.constant dense<0.000000e+00> : vector<2x128xf32>
    %20 = tpu.matmul %16, %19, %cst_19 {dimension_numbers = #tpu.dot_dimension_numbers<[1], [0], [0], [1], [0, 0, 1, 1], [], []>} : vector<2x16xf32>, vector<16x128xf32>, vector<2x128xf32> -> vector<2x128xf32>
    %c0_20 = arith.constant 0 : index
    %c0_21 = arith.constant 0 : index
    %21 = vector.load %arg15[%c0_20, %c0_21] : memref<32x128xf32, #tpu.memory_space<vmem>>, vector<32x128xf32>
    %cst_22 = arith.constant dense<0.000000e+00> : vector<2x128xf32>
    %22 = tpu.matmul %17, %21, %cst_22 {dimension_numbers = #tpu.dot_dimension_numbers<[1], [0], [0], [1], [0, 0, 1, 1], [], []>} : vector<2x32xf32>, vector<32x128xf32>, vector<2x128xf32> -> vector<2x128xf32>
    %23 = arith.addf %20, %22 : vector<2x128xf32>
    %c0_23 = arith.constant 0 : index
    %c0_24 = arith.constant 0 : index
    %24 = vector.load %arg16[%c0_23, %c0_24] : memref<1x128xf32, #tpu.memory_space<vmem>>, vector<1x128xf32>
    %25 = vector.broadcast %24 : vector<1x128xf32> to vector<2x128xf32>
    %26 = arith.addf %23, %25 : vector<2x128xf32>
    %27 = arith.negf %26 : vector<2x128xf32>
    %28 = math.exp %27 : vector<2x128xf32>
    %cst_25 = arith.constant 1.000000e+00 : f32
    %29 = vector.broadcast %cst_25 : f32 to vector<2x128xf32>
    %30 = arith.addf %29, %28 : vector<2x128xf32>
    %31 = arith.divf %29, %30 : vector<2x128xf32>
    %32 = math.tanh %26 : vector<2x128xf32>
    %33 = vector.extract_strided_slice %31 {offsets = [0, 0], sizes = [2, 32], strides = [1, 1]} : vector<2x128xf32> to vector<2x32xf32>
    %34 = vector.extract_strided_slice %31 {offsets = [0, 32], sizes = [2, 32], strides = [1, 1]} : vector<2x128xf32> to vector<2x32xf32>
    %35 = vector.extract_strided_slice %32 {offsets = [0, 64], sizes = [2, 32], strides = [1, 1]} : vector<2x128xf32> to vector<2x32xf32>
    %36 = vector.extract_strided_slice %31 {offsets = [0, 96], sizes = [2, 32], strides = [1, 1]} : vector<2x128xf32> to vector<2x32xf32>
    %37 = arith.mulf %34, %18 : vector<2x32xf32>
    %38 = arith.mulf %33, %35 : vector<2x32xf32>
    %39 = arith.addf %37, %38 : vector<2x32xf32>
    %40 = math.tanh %39 : vector<2x32xf32>
    %41 = arith.mulf %36, %40 : vector<2x32xf32>
    %c0_26 = arith.constant 0 : index
    %c0_27 = arith.constant 0 : index
    %42 = vector.load %arg17[%c0_26, %c0_27] : memref<32x64xf32, #tpu.memory_space<vmem>>, vector<32x64xf32>
    %cst_28 = arith.constant dense<0.000000e+00> : vector<2x64xf32>
    %43 = tpu.matmul %41, %42, %cst_28 {dimension_numbers = #tpu.dot_dimension_numbers<[1], [0], [0], [1], [0, 0, 1, 1], [], []>} : vector<2x32xf32>, vector<32x64xf32>, vector<2x64xf32> -> vector<2x64xf32>
    %c0_29 = arith.constant 0 : index
    %c0_30 = arith.constant 0 : index
    %44 = vector.load %arg18[%c0_29, %c0_30] : memref<32x64xf32, #tpu.memory_space<vmem>>, vector<32x64xf32>
    %cst_31 = arith.constant dense<0.000000e+00> : vector<2x64xf32>
    %45 = tpu.matmul %39, %44, %cst_31 {dimension_numbers = #tpu.dot_dimension_numbers<[1], [0], [0], [1], [0, 0, 1, 1], [], []>} : vector<2x32xf32>, vector<32x64xf32>, vector<2x64xf32> -> vector<2x64xf32>
    %46 = arith.addf %43, %45 : vector<2x64xf32>
    %c0_32 = arith.constant 0 : index
    %c0_33 = arith.constant 0 : index
    %47 = vector.load %arg19[%c0_32, %c0_33] : memref<1x64xf32, #tpu.memory_space<vmem>>, vector<1x64xf32>
    %48 = vector.broadcast %47 : vector<1x64xf32> to vector<2x64xf32>
    %49 = arith.addf %46, %48 : vector<2x64xf32>
    %c0_34 = arith.constant 0 : index
    %c0_35 = arith.constant 0 : index
    %50 = vector.load %arg9[%c0_34, %c0_35] : memref<2x8xf32, #tpu.memory_space<vmem>>, vector<2x8xf32>
    %c0_36 = arith.constant 0 : index
    %c0_37 = arith.constant 0 : index
    %c0_38 = arith.constant 0 : index
    %51 = vector.load %arg6[%c0_36, %c0_37, %c0_38] : memref<2x8x64xf32, #tpu.memory_space<vmem>>, vector<2x8x64xf32>
    %52 = vector.shape_cast %49 : vector<2x64xf32> to vector<2x1x64xf32>
    %53 = vector.broadcast %52 : vector<2x1x64xf32> to vector<2x8x64xf32>
    %54 = arith.addf %51, %53 : vector<2x8x64xf32>
    %55 = vector.shape_cast %50 : vector<2x8xf32> to vector<2x8x1xf32>
    %c0_39 = arith.constant 0 : index
    %c0_40 = arith.constant 0 : index
    %56 = vector.load %arg20[%c0_39, %c0_40] : memref<1x64xf32, #tpu.memory_space<vmem>>, vector<1x64xf32>
    %57 = vector.shape_cast %56 : vector<1x64xf32> to vector<1x1x64xf32>
    %58 = vector.broadcast %55 : vector<2x8x1xf32> to vector<2x8x64xf32>
    %59 = vector.broadcast %57 : vector<1x1x64xf32> to vector<2x8x64xf32>
    %60 = arith.mulf %58, %59 : vector<2x8x64xf32>
    %61 = arith.addf %54, %60 : vector<2x8x64xf32>
    %62 = math.tanh %61 : vector<2x8x64xf32>
    %c0_41 = arith.constant 0 : index
    %c0_42 = arith.constant 0 : index
    %63 = vector.load %arg21[%c0_41, %c0_42] : memref<1x64xf32, #tpu.memory_space<vmem>>, vector<1x64xf32>
    %64 = vector.shape_cast %63 : vector<1x64xf32> to vector<1x1x64xf32>
    %65 = vector.broadcast %64 : vector<1x1x64xf32> to vector<2x8x64xf32>
    %66 = arith.mulf %62, %65 : vector<2x8x64xf32>
    %cst_43 = arith.constant dense<0.000000e+00> : vector<2x8xf32>
    %67 = vector.multi_reduction <add>, %66, %cst_43 [2] : vector<2x8x64xf32> to vector<2x8xf32>
    %cst_44 = arith.constant dense<0xFF800000> : vector<2xf32>
    %68 = vector.multi_reduction <maximumf>, %67, %cst_44 [1] : vector<2x8xf32> to vector<2xf32>
    %69 = vector.shape_cast %68 : vector<2xf32> to vector<2x1xf32>
    %70 = vector.broadcast %69 : vector<2x1xf32> to vector<2x8xf32>
    %71 = arith.subf %67, %70 : vector<2x8xf32>
    %72 = math.exp %71 : vector<2x8xf32>
    %cst_45 = arith.constant dense<0.000000e+00> : vector<2xf32>
    %73 = vector.multi_reduction <add>, %72, %cst_45 [1] : vector<2x8xf32> to vector<2xf32>
    %74 = vector.shape_cast %73 : vector<2xf32> to vector<2x1xf32>
    %75 = vector.broadcast %74 : vector<2x1xf32> to vector<2x8xf32>
    %76 = arith.divf %72, %75 : vector<2x8xf32>
    %c0_46 = arith.constant 0 : index
    %c0_47 = arith.constant 0 : index
    %77 = vector.load %arg7[%c0_46, %c0_47] : memref<2x8xf32, #tpu.memory_space<vmem>>, vector<2x8xf32>
    %78 = arith.mulf %76, %77 : vector<2x8xf32>
    %cst_48 = arith.constant dense<0.000000e+00> : vector<2xf32>
    %79 = vector.multi_reduction <add>, %78, %cst_48 [1] : vector<2x8xf32> to vector<2xf32>
    %80 = vector.shape_cast %79 : vector<2xf32> to vector<2x1xf32>
    %81 = vector.broadcast %80 : vector<2x1xf32> to vector<2x8xf32>
    %82 = arith.divf %78, %81 : vector<2x8xf32>
    %83 = vector.shape_cast %82 : vector<2x8xf32> to vector<2x8x1xf32>
    %c0_49 = arith.constant 0 : index
    %c0_50 = arith.constant 0 : index
    %c0_51 = arith.constant 0 : index
    %84 = vector.load %arg5[%c0_49, %c0_50, %c0_51] : memref<2x8x64xf32, #tpu.memory_space<vmem>>, vector<2x8x64xf32>
    %85 = vector.broadcast %83 : vector<2x8x1xf32> to vector<2x8x64xf32>
    %86 = arith.mulf %85, %84 : vector<2x8x64xf32>
    %cst_52 = arith.constant dense<0.000000e+00> : vector<2x64xf32>
    %87 = vector.multi_reduction <add>, %86, %cst_52 [1] : vector<2x8x64xf32> to vector<2x64xf32>
    %88 = arith.addf %50, %82 : vector<2x8xf32>
    %c0_53 = arith.constant 0 : index
    %c0_54 = arith.constant 0 : index
    %89 = vector.load %arg22[%c0_53, %c0_54] : memref<1x64xf32, #tpu.memory_space<vmem>>, vector<1x64xf32>
    %90 = vector.broadcast %89 : vector<1x64xf32> to vector<2x64xf32>
    %91 = arith.mulf %87, %90 : vector<2x64xf32>
    %cst_55 = arith.constant dense<0.000000e+00> : vector<2xf32>
    %92 = vector.multi_reduction <add>, %91, %cst_55 [1] : vector<2x64xf32> to vector<2xf32>
    %93 = vector.shape_cast %92 : vector<2xf32> to vector<2x1xf32>
    %c0_56 = arith.constant 0 : index
    %c0_57 = arith.constant 0 : index
    %94 = vector.load %arg23[%c0_56, %c0_57] : memref<1x32xf32, #tpu.memory_space<vmem>>, vector<1x32xf32>
    %95 = vector.broadcast %94 : vector<1x32xf32> to vector<2x32xf32>
    %96 = arith.mulf %41, %95 : vector<2x32xf32>
    %cst_58 = arith.constant dense<0.000000e+00> : vector<2xf32>
    %97 = vector.multi_reduction <add>, %96, %cst_58 [1] : vector<2x32xf32> to vector<2xf32>
    %98 = vector.shape_cast %97 : vector<2xf32> to vector<2x1xf32>
    %99 = arith.addf %93, %98 : vector<2x1xf32>
    %c0_59 = arith.constant 0 : index
    %c0_60 = arith.constant 0 : index
    %100 = vector.load %arg24[%c0_59, %c0_60] : memref<1x32xf32, #tpu.memory_space<vmem>>, vector<1x32xf32>
    %101 = vector.broadcast %100 : vector<1x32xf32> to vector<2x32xf32>
    %102 = arith.mulf %39, %101 : vector<2x32xf32>
    %cst_61 = arith.constant dense<0.000000e+00> : vector<2xf32>
    %103 = vector.multi_reduction <add>, %102, %cst_61 [1] : vector<2x32xf32> to vector<2xf32>
    %104 = vector.shape_cast %103 : vector<2xf32> to vector<2x1xf32>
    %105 = arith.addf %99, %104 : vector<2x1xf32>
    %c0_62 = arith.constant 0 : index
    %c0_63 = arith.constant 0 : index
    %106 = vector.load %arg25[%c0_62, %c0_63] : memref<1x16xf32, #tpu.memory_space<vmem>>, vector<1x16xf32>
    %107 = vector.broadcast %106 : vector<1x16xf32> to vector<2x16xf32>
    %108 = arith.mulf %16, %107 : vector<2x16xf32>
    %cst_64 = arith.constant dense<0.000000e+00> : vector<2xf32>
    %109 = vector.multi_reduction <add>, %108, %cst_64 [1] : vector<2x16xf32> to vector<2xf32>
    %110 = vector.shape_cast %109 : vector<2xf32> to vector<2x1xf32>
    %111 = arith.addf %105, %110 : vector<2x1xf32>
    %c0_65 = arith.constant 0 : index
    %c0_66 = arith.constant 0 : index
    %112 = vector.load %arg26[%c0_65, %c0_66] : memref<1x1xf32, #tpu.memory_space<vmem>>, vector<1x1xf32>
    %113 = vector.broadcast %112 : vector<1x1xf32> to vector<2x1xf32>
    %114 = arith.addf %111, %113 : vector<2x1xf32>
    %115 = arith.negf %114 : vector<2x1xf32>
    %116 = math.exp %115 : vector<2x1xf32>
    %cst_67 = arith.constant 1.000000e+00 : f32
    %117 = vector.broadcast %cst_67 : f32 to vector<2x1xf32>
    %118 = arith.addf %117, %116 : vector<2x1xf32>
    %119 = arith.divf %117, %118 : vector<2x1xf32>
    %c0_68 = arith.constant 0 : index
    %c0_69 = arith.constant 0 : index
    %120 = vector.load %arg27[%c0_68, %c0_69] : memref<32x32xf32, #tpu.memory_space<vmem>>, vector<32x32xf32>
    %cst_70 = arith.constant dense<0.000000e+00> : vector<2x32xf32>
    %121 = tpu.matmul %41, %120, %cst_70 {dimension_numbers = #tpu.dot_dimension_numbers<[1], [0], [0], [1], [0, 0, 1, 1], [], []>} : vector<2x32xf32>, vector<32x32xf32>, vector<2x32xf32> -> vector<2x32xf32>
    %c0_71 = arith.constant 0 : index
    %c0_72 = arith.constant 0 : index
    %122 = vector.load %arg28[%c0_71, %c0_72] : memref<64x32xf32, #tpu.memory_space<vmem>>, vector<64x32xf32>
    %cst_73 = arith.constant dense<0.000000e+00> : vector<2x32xf32>
    %123 = tpu.matmul %87, %122, %cst_73 {dimension_numbers = #tpu.dot_dimension_numbers<[1], [0], [0], [1], [0, 0, 1, 1], [], []>} : vector<2x64xf32>, vector<64x32xf32>, vector<2x32xf32> -> vector<2x32xf32>
    %124 = arith.addf %121, %123 : vector<2x32xf32>
    %c0_74 = arith.constant 0 : index
    %c0_75 = arith.constant 0 : index
    %125 = vector.load %arg29[%c0_74, %c0_75] : memref<1x32xf32, #tpu.memory_space<vmem>>, vector<1x32xf32>
    %126 = vector.broadcast %125 : vector<1x32xf32> to vector<2x32xf32>
    %127 = arith.addf %124, %126 : vector<2x32xf32>
    %c0_76 = arith.constant 0 : index
    %c0_77 = arith.constant 0 : index
    %128 = vector.load %arg30[%c0_76, %c0_77] : memref<32x54xf32, #tpu.memory_space<vmem>>, vector<32x54xf32>
    %cst_78 = arith.constant dense<0.000000e+00> : vector<2x54xf32>
    %129 = tpu.matmul %127, %128, %cst_78 {dimension_numbers = #tpu.dot_dimension_numbers<[1], [0], [0], [1], [0, 0, 1, 1], [], []>} : vector<2x32xf32>, vector<32x54xf32>, vector<2x54xf32> -> vector<2x54xf32>
    %c0_79 = arith.constant 0 : index
    %c0_80 = arith.constant 0 : index
    %130 = vector.load %arg31[%c0_79, %c0_80] : memref<1x54xf32, #tpu.memory_space<vmem>>, vector<1x54xf32>
    %131 = vector.broadcast %130 : vector<1x54xf32> to vector<2x54xf32>
    %132 = arith.addf %129, %131 : vector<2x54xf32>
    %cst_81 = arith.constant dense<0xFF800000> : vector<2xf32>
    %133 = vector.multi_reduction <maximumf>, %132, %cst_81 [1] : vector<2x54xf32> to vector<2xf32>
    %134 = vector.shape_cast %133 : vector<2xf32> to vector<2x1xf32>
    %135 = vector.broadcast %134 : vector<2x1xf32> to vector<2x54xf32>
    %136 = arith.subf %132, %135 : vector<2x54xf32>
    %137 = math.exp %136 : vector<2x54xf32>
    %cst_82 = arith.constant dense<0.000000e+00> : vector<2xf32>
    %138 = vector.multi_reduction <add>, %137, %cst_82 [1] : vector<2x54xf32> to vector<2xf32>
    %139 = vector.shape_cast %138 : vector<2xf32> to vector<2x1xf32>
    %140 = vector.broadcast %139 : vector<2x1xf32> to vector<2x54xf32>
    %141 = arith.divf %137, %140 : vector<2x54xf32>
    %142 = vector.broadcast %119 : vector<2x1xf32> to vector<2x54xf32>
    %143 = arith.mulf %142, %141 : vector<2x54xf32>
    %cst_83 = arith.constant 1.000000e+00 : f32
    %144 = vector.broadcast %cst_83 : f32 to vector<2x1xf32>
    %145 = arith.subf %144, %119 : vector<2x1xf32>
    %146 = vector.broadcast %145 : vector<2x1xf32> to vector<2x8xf32>
    %147 = arith.mulf %146, %82 : vector<2x8xf32>
    %c0_84 = arith.constant 0 : index
    %c0_85 = arith.constant 0 : index
    %148 = vector.load %arg10[%c0_84, %c0_85] : memref<2x8xi32, #tpu.memory_space<vmem>>, vector<2x8xi32>
    %149 = tpu.iota {dimensions = array<i32: 2>} : vector<2x8x54xi32>
    %150 = vector.shape_cast %148 : vector<2x8xi32> to vector<2x8x1xi32>
    %151 = vector.broadcast %150 : vector<2x8x1xi32> to vector<2x8x54xi32>
    %152 = arith.cmpi eq, %151, %149 : vector<2x8x54xi32>
    %153 = arith.extui %152 : vector<2x8x54xi1> to vector<2x8x54xi32>
    %154 = arith.sitofp %153 : vector<2x8x54xi32> to vector<2x8x54xf32>
    %155 = vector.shape_cast %147 : vector<2x8xf32> to vector<2x8x1xf32>
    %156 = vector.broadcast %155 : vector<2x8x1xf32> to vector<2x8x54xf32>
    %157 = arith.mulf %156, %154 : vector<2x8x54xf32>
    %cst_86 = arith.constant dense<0.000000e+00> : vector<2x54xf32>
    %158 = vector.multi_reduction <add>, %157, %cst_86 [1] : vector<2x8x54xf32> to vector<2x54xf32>
    %159 = arith.addf %143, %158 : vector<2x54xf32>
    %c0_87 = arith.constant 0 : index
    %c0_88 = arith.constant 0 : index
    %160 = vector.load %arg32[%c0_87, %c0_88] : memref<2x54xf32, #tpu.memory_space<vmem>>, vector<2x54xf32>
    tpu.vector_store %arg32[%c0_87, %c0_88], %159 {strides = array<i32>} : memref<2x54xf32, #tpu.memory_space<vmem>>, vector<2x54xf32>,
    %c0_89 = arith.constant 0 : index
    %c0_90 = arith.constant 0 : index
    %161 = vector.load %arg33[%c0_89, %c0_90] : memref<2x32xf32, #tpu.memory_space<vmem>>, vector<2x32xf32>
    tpu.vector_store %arg33[%c0_89, %c0_90], %41 {strides = array<i32>} : memref<2x32xf32, #tpu.memory_space<vmem>>, vector<2x32xf32>,
    %c0_91 = arith.constant 0 : index
    %c0_92 = arith.constant 0 : index
    %162 = vector.load %arg34[%c0_91, %c0_92] : memref<2x32xf32, #tpu.memory_space<vmem>>, vector<2x32xf32>
    tpu.vector_store %arg34[%c0_91, %c0_92], %39 {strides = array<i32>} : memref<2x32xf32, #tpu.memory_space<vmem>>, vector<2x32xf32>,
    %c0_93 = arith.constant 0 : index
    %c0_94 = arith.constant 0 : index
    %163 = vector.load %arg35[%c0_93, %c0_94] : memref<2x64xf32, #tpu.memory_space<vmem>>, vector<2x64xf32>
    tpu.vector_store %arg35[%c0_93, %c0_94], %87 {strides = array<i32>} : memref<2x64xf32, #tpu.memory_space<vmem>>, vector<2x64xf32>,
    %c0_95 = arith.constant 0 : index
    %c0_96 = arith.constant 0 : index
    %164 = vector.load %arg36[%c0_95, %c0_96] : memref<2x8xf32, #tpu.memory_space<vmem>>, vector<2x8xf32>
    tpu.vector_store %arg36[%c0_95, %c0_96], %82 {strides = array<i32>} : memref<2x8xf32, #tpu.memory_space<vmem>>, vector<2x8xf32>,
    %c0_97 = arith.constant 0 : index
    %c0_98 = arith.constant 0 : index
    %165 = vector.load %arg37[%c0_97, %c0_98] : memref<2x1xf32, #tpu.memory_space<vmem>>, vector<2x1xf32>
    tpu.vector_store %arg37[%c0_97, %c0_98], %119 {strides = array<i32>} : memref<2x1xf32, #tpu.memory_space<vmem>>, vector<2x1xf32>,
    %c0_99 = arith.constant 0 : index
    %c0_100 = arith.constant 0 : index
    %166 = vector.load %arg38[%c0_99, %c0_100] : memref<2x8xf32, #tpu.memory_space<vmem>>, vector<2x8xf32>
    tpu.vector_store %arg38[%c0_99, %c0_100], %88 {strides = array<i32>} : memref<2x8xf32, #tpu.memory_space<vmem>>, vector<2x8xf32>,
    return
  }
  func.func @transform_0(%arg0: i32) -> (i32, i32) {
    %c0_i32 = arith.constant 0 : i32
    %c0_i32_0 = arith.constant 0 : i32
    %c0_i32_1 = arith.constant 0 : i32
    return %c0_i32, %c0_i32_0 : i32, i32
  }
  func.func @transform_1(%arg0: i32) -> (i32, i32) {
    %c0_i32 = arith.constant 0 : i32
    %c0_i32_0 = arith.constant 0 : i32
    %c0_i32_1 = arith.constant 0 : i32
    return %c0_i32, %c0_i32_0 : i32, i32
  }
  func.func @transform_2(%arg0: i32) -> (i32, i32) {
    %c0_i32 = arith.constant 0 : i32
    %c0_i32_0 = arith.constant 0 : i32
    %c0_i32_1 = arith.constant 0 : i32
    return %c0_i32, %c0_i32_0 : i32, i32
  }
  func.func @transform_3(%arg0: i32) -> (i32, i32) {
    %c0_i32 = arith.constant 0 : i32
    %c0_i32_0 = arith.constant 0 : i32
    %c0_i32_1 = arith.constant 0 : i32
    return %c0_i32, %c0_i32_0 : i32, i32
  }
  func.func @transform_4(%arg0: i32) -> (i32, i32, i32) {
    %c0_i32 = arith.constant 0 : i32
    %c0_i32_0 = arith.constant 0 : i32
    %c0_i32_1 = arith.constant 0 : i32
    %c0_i32_2 = arith.constant 0 : i32
    return %c0_i32, %c0_i32_0, %c0_i32_1 : i32, i32, i32
  }
  func.func @transform_5(%arg0: i32) -> (i32, i32, i32) {
    %c0_i32 = arith.constant 0 : i32
    %c0_i32_0 = arith.constant 0 : i32
    %c0_i32_1 = arith.constant 0 : i32
    %c0_i32_2 = arith.constant 0 : i32
    return %c0_i32, %c0_i32_0, %c0_i32_1 : i32, i32, i32
  }
  func.func @transform_6(%arg0: i32) -> (i32, i32) {
    %c0_i32 = arith.constant 0 : i32
    %c0_i32_0 = arith.constant 0 : i32
    %c0_i32_1 = arith.constant 0 : i32
    return %c0_i32, %c0_i32_0 : i32, i32
  }
  func.func @transform_7(%arg0: i32) -> (i32, i32) {
    %c0_i32 = arith.constant 0 : i32
    %c0_i32_0 = arith.constant 0 : i32
    %c0_i32_1 = arith.constant 0 : i32
    return %c0_i32, %c0_i32_0 : i32, i32
  }
  func.func @transform_8(%arg0: i32) -> (i32, i32) {
    %c0_i32 = arith.constant 0 : i32
    %c0_i32_0 = arith.constant 0 : i32
    %c0_i32_1 = arith.constant 0 : i32
    return %c0_i32, %c0_i32_0 : i32, i32
  }
  func.func @transform_9(%arg0: i32) -> (i32, i32) {
    %c0_i32 = arith.constant 0 : i32
    %c0_i32_0 = arith.constant 0 : i32
    %c0_i32_1 = arith.constant 0 : i32
    return %c0_i32, %c0_i32_0 : i32, i32
  }
  func.func @transform_10(%arg0: i32) -> (i32, i32) {
    %c0_i32 = arith.constant 0 : i32
    %c0_i32_0 = arith.constant 0 : i32
    %c0_i32_1 = arith.constant 0 : i32
    return %c0_i32, %c0_i32_0 : i32, i32
  }
  func.func @transform_11(%arg0: i32) -> (i32, i32) {
    %c0_i32 = arith.constant 0 : i32
    %c0_i32_0 = arith.constant 0 : i32
    %c0_i32_1 = arith.constant 0 : i32
    return %c0_i32, %c0_i32_0 : i32, i32
  }
  func.func @transform_12(%arg0: i32) -> (i32, i32) {
    %c0_i32 = arith.constant 0 : i32
    %c0_i32_0 = arith.constant 0 : i32
    %c0_i32_1 = arith.constant 0 : i32
    return %c0_i32, %c0_i32_0 : i32, i32
  }
  func.func @transform_13(%arg0: i32) -> (i32, i32) {
    %c0_i32 = arith.constant 0 : i32
    %c0_i32_0 = arith.constant 0 : i32
    %c0_i32_1 = arith.constant 0 : i32
    return %c0_i32, %c0_i32_0 : i32, i32
  }
  func.func @transform_14(%arg0: i32) -> (i32, i32) {
    %c0_i32 = arith.constant 0 : i32
    %c0_i32_0 = arith.constant 0 : i32
    %c0_i32_1 = arith.constant 0 : i32
    return %c0_i32, %c0_i32_0 : i32, i32
  }
  func.func @transform_15(%arg0: i32) -> (i32, i32) {
    %c0_i32 = arith.constant 0 : i32
    %c0_i32_0 = arith.constant 0 : i32
    %c0_i32_1 = arith.constant 0 : i32
    return %c0_i32, %c0_i32_0 : i32, i32
  }
  func.func @transform_16(%arg0: i32) -> (i32, i32) {
    %c0_i32 = arith.constant 0 : i32
    %c0_i32_0 = arith.constant 0 : i32
    %c0_i32_1 = arith.constant 0 : i32
    return %c0_i32, %c0_i32_0 : i32, i32
  }
  func.func @transform_17(%arg0: i32) -> (i32, i32) {
    %c0_i32 = arith.constant 0 : i32
    %c0_i32_0 = arith.constant 0 : i32
    %c0_i32_1 = arith.constant 0 : i32
    return %c0_i32, %c0_i32_0 : i32, i32
  }
  func.func @transform_18(%arg0: i32) -> (i32, i32) {
    %c0_i32 = arith.constant 0 : i32
    %c0_i32_0 = arith.constant 0 : i32
    %c0_i32_1 = arith.constant 0 : i32
    return %c0_i32, %c0_i32_0 : i32, i32
  }
  func.func @transform_19(%arg0: i32) -> (i32, i32) {
    %c0_i32 = arith.constant 0 : i32
    %c0_i32_0 = arith.constant 0 : i32
    %c0_i32_1 = arith.constant 0 : i32
    return %c0_i32, %c0_i32_0 : i32, i32
  }
  func.func @transform_20(%arg0: i32) -> (i32, i32) {
    %c0_i32 = arith.constant 0 : i32
    %c0_i32_0 = arith.constant 0 : i32
    %c0_i32_1 = arith.constant 0 : i32
    return %c0_i32, %c0_i32_0 : i32, i32
  }
  func.func @transform_21(%arg0: i32) -> (i32, i32) {
    %c0_i32 = arith.constant 0 : i32
    %c0_i32_0 = arith.constant 0 : i32
    %c0_i32_1 = arith.constant 0 : i32
    return %c0_i32, %c0_i32_0 : i32, i32
  }
  func.func @transform_22(%arg0: i32) -> (i32, i32) {
    %c0_i32 = arith.constant 0 : i32
    %c0_i32_0 = arith.constant 0 : i32
    %c0_i32_1 = arith.constant 0 : i32
    return %c0_i32, %c0_i32_0 : i32, i32
  }
  func.func @transform_23(%arg0: i32) -> (i32, i32) {
    %c0_i32 = arith.constant 0 : i32
    %c0_i32_0 = arith.constant 0 : i32
    %c0_i32_1 = arith.constant 0 : i32
    return %c0_i32, %c0_i32_0 : i32, i32
  }
  func.func @transform_24(%arg0: i32) -> (i32, i32) {
    %c0_i32 = arith.constant 0 : i32
    %c0_i32_0 = arith.constant 0 : i32
    %c0_i32_1 = arith.constant 0 : i32
    return %c0_i32, %c0_i32_0 : i32, i32
  }
  func.func @transform_25(%arg0: i32) -> (i32, i32) {
    %c0_i32 = arith.constant 0 : i32
    %c0_i32_0 = arith.constant 0 : i32
    %c0_i32_1 = arith.constant 0 : i32
    return %c0_i32, %c0_i32_0 : i32, i32
  }
  func.func @transform_26(%arg0: i32) -> (i32, i32) {
    %c0_i32 = arith.constant 0 : i32
    %c0_i32_0 = arith.constant 0 : i32
    %c0_i32_1 = arith.constant 0 : i32
    return %c0_i32, %c0_i32_0 : i32, i32
  }
  func.func @transform_27(%arg0: i32) -> (i32, i32) {
    %c0_i32 = arith.constant 0 : i32
    %c0_i32_0 = arith.constant 0 : i32
    %c0_i32_1 = arith.constant 0 : i32
    return %c0_i32, %c0_i32_0 : i32, i32
  }
  func.func @transform_28(%arg0: i32) -> (i32, i32) {
    %c0_i32 = arith.constant 0 : i32
    %c0_i32_0 = arith.constant 0 : i32
    %c0_i32_1 = arith.constant 0 : i32
    return %c0_i32, %c0_i32_0 : i32, i32
  }
  func.func @transform_29(%arg0: i32) -> (i32, i32) {
    %c0_i32 = arith.constant 0 : i32
    %c0_i32_0 = arith.constant 0 : i32
    %c0_i32_1 = arith.constant 0 : i32
    return %c0_i32, %c0_i32_0 : i32, i32
  }
  func.func @transform_30(%arg0: i32) -> (i32, i32) {
    %c0_i32 = arith.constant 0 : i32
    %c0_i32_0 = arith.constant 0 : i32
    %c0_i32_1 = arith.constant 0 : i32
    return %c0_i32, %c0_i32_0 : i32, i32
  }
  func.func @transform_31(%arg0: i32) -> (i32, i32) {
    %c0_i32 = arith.constant 0 : i32
    %c0_i32_0 = arith.constant 0 : i32
    %c0_i32_1 = arith.constant 0 : i32
    return %c0_i32, %c0_i32_0 : i32, i32
  }
  func.func @transform_32(%arg0: i32) -> (i32, i32) {
    %c0_i32 = arith.constant 0 : i32
    %c0_i32_0 = arith.constant 0 : i32
    %c0_i32_1 = arith.constant 0 : i32
    return %c0_i32, %c0_i32_0 : i32, i32
  }
  func.func @transform_33(%arg0: i32) -> (i32, i32) {
    %c0_i32 = arith.constant 0 : i32
    %c0_i32_0 = arith.constant 0 : i32
    %c0_i32_1 = arith.constant 0 : i32
    return %c0_i32, %c0_i32_0 : i32, i32
  }
  func.func @transform_34(%arg0: i32) -> (i32, i32) {
    %c0_i32 = arith.constant 0 : i32
    %c0_i32_0 = arith.constant 0 : i32
    %c0_i32_1 = arith.constant 0 : i32
    return %c0_i32, %c0_i32_0 : i32, i32
  }
  func.func @transform_35(%arg0: i32) -> (i32, i32) {
    %c0_i32 = arith.constant 0 : i32
    %c0_i32_0 = arith.constant 0 : i32
    %c0_i32_1 = arith.constant 0 : i32
    return %c0_i32, %c0_i32_0 : i32, i32
  }
  func.func @transform_36(%arg0: i32) -> (i32, i32) {
    %c0_i32 = arith.constant 0 : i32
    %c0_i32_0 = arith.constant 0 : i32
    %c0_i32_1 = arith.constant 0 : i32
    return %c0_i32, %c0_i32_0 : i32, i32
  }
  func.func @transform_37(%arg0: i32) -> (i32, i32) {
    %c0_i32 = arith.constant 0 : i32
    %c0_i32_0 = arith.constant 0 : i32
    %c0_i32_1 = arith.constant 0 : i32
    return %c0_i32, %c0_i32_0 : i32, i32
  }
}

</mosaic_0001>

<bundles_post_ra>
// kernel: tpu_custom_call.1
= control target key start
LH: loop header
LB: loop body
LE: loop exit
PB: predicated region body
PF: predicated region fallthrough
CT: control target
= control target key end

     0   :  { %s2100_s6 = smov 1   ;;  %s2101_s10 = smov 2   ;;  %s2605_s0 = inlined_call_operand.smem [shape: u32[38], index: -1, kind: input, shape index: {}] }
   0x1   :  { %s2160_s5 = sld [smem:[%s2605_s0]]   ;;  %s2102_s14 = smov 3  }
   0x2   :  { %s2165_s9 = sld [smem:[%s2605_s0 + %s2100_s6]]   ;;  %s2103_s18 = smov 4  }
   0x3   :  { %s2170_s13 = sld [smem:[%s2605_s0 + %s2101_s10]]   ;;  %s2104_s22 = smov 5  }
   0x4   :  { %s2175_s17 = sld [smem:[%s2605_s0 + %s2102_s14]]   ;;  %s2105_s26 = smov 6  }
   0x5   :  { %s2180_s21 = sld [smem:[%s2605_s0 + %s2103_s18]]   ;;  %s2106_s30 = smov 7  }
   0x6   :  { %s2185_s25 = sld [smem:[%s2605_s0 + %s2104_s22]]   ;;  %s2107_s4 = smov 8  }
   0x7   :  { %s2190_s29 = sld [smem:[%s2605_s0 + %s2105_s26]]   ;;  %s2108_s10 = smov 9  }
   0x8   :  { %s2195_s3 = sld [smem:[%s2605_s0 + %s2106_s30]]   ;;  %s2109_s15 = smov 10  }
   0x9   :  { %s2200_s8 = sld [smem:[%s2605_s0 + %s2107_s4]]   ;;  %s2110_s20 = smov 11  }
   0xa   :  { %s2205_s14 = sld [smem:[%s2605_s0 + %s2108_s10]]   ;;  %s2111_s26 = smov 12  }
   0xb   :  { %2613 = sst [smem:[#allocation20_spill]] %s2180_s21  ;;  %s2112_s1 = smov 13  }
   0xc   :  { %2614 = sst [smem:[#allocation21_spill]] %s2185_s25  ;;  %s2113_s7 = smov 14  }
   0xd   :  { %2615 = sst [smem:[#allocation22_spill]] %s2190_s29  ;;  %s2115_s22 = smov 16  }
   0xe   :  { %s2210_s19 = sld [smem:[%s2605_s0 + %s2109_s15]]   ;;  %s2114_s15 = smov 15  }
   0xf   :  { %2616 = sst [smem:[#allocation23_spill]] %s2200_s8  ;;  %s2116_s28 = smov 17  }
  0x10   :  { %2617 = sst [smem:[#allocation24_spill]] %s2205_s14  ;;  %s2125_s10 = smov 26  }
  0x11   :  { %s2215_s24 = sld [smem:[%s2605_s0 + %s2110_s20]]   ;;  %s2126_s16 = smov 27  }
  0x12   :  { %s2220_s30 = sld [smem:[%s2605_s0 + %s2111_s26]]   ;;  %s2127_s23 = smov 28  }
  0x13   :  { %s2225_s6 = sld [smem:[%s2605_s0 + %s2112_s1]]   ;;  %s2128_s1 = smov 29  }
  0x14   :  { %s2230_s12 = sld [smem:[%s2605_s0 + %s2113_s7]]   ;;  %s2117_s7 = smov 18  }
  0x15   :  { %s2235_s20 = sld [smem:[%s2605_s0 + %s2114_s15]]   ;;  %s2118_s15 = smov 19  }
  0x16   :  { %s2240_s27 = sld [smem:[%s2605_s0 + %s2115_s22]]   ;;  %s2119_s22 = smov 20  }
  0x17   :  { %s2245_s4 = sld [smem:[%s2605_s0 + %s2116_s28]]   ;;  %s2120_s28 = smov 21  }
  0x18   :  { %s2250_s14 = sld [smem:[%s2605_s0 + %s2117_s7]]   ;;  %s2121_s7 = smov 22  }
  0x19   :  { %s2255_s21 = sld [smem:[%s2605_s0 + %s2118_s15]]   ;;  %s2122_s15 = smov 23  }
  0x1a   :  { %s2260_s29 = sld [smem:[%s2605_s0 + %s2119_s22]]   ;;  %s2123_s22 = smov 24  }
  0x1b   :  { %s2265_s25 = sld [smem:[%s2605_s0 + %s2120_s28]]   ;;  %s2124_s28 = smov 25  }
  0x1c   :  { %s2303_s8 = sld [smem:[%s2605_s0 + %s2128_s1]]   ;;  %s2132_s1 = smov 33  }
  0x1e   :  { %2618 = sst [smem:[#allocation25_spill]] %s2250_s14 }
  0x1f   :  { %2619 = sst [smem:[#allocation26_spill]] %s2255_s21 }
  0x20   :  { %2620 = sst [smem:[#allocation27_spill]] %s2260_s29 }
  0x21   :  { %2621 = sst [smem:[#allocation28_spill]] %s2265_s25 }
  0x22   :  { %s2270_s14 = sld [smem:[%s2605_s0 + %s2121_s7]]   ;;  %s2133_s7 = smov 34  }
  0x23   :  { %s2275_s21 = sld [smem:[%s2605_s0 + %s2122_s15]]  }
  0x24   :  { %s2280_s29 = sld [smem:[%s2605_s0 + %s2123_s22]]  }
  0x25   :  { %s1559_s25 = sld [smem:[%s2605_s0 + %s2124_s28]]  }
  0x28   :  { %2622 = sst [smem:[#allocation29_spill]] %s2270_s14 }
  0x29   :  { %2623 = sst [smem:[#allocation30_spill]] %s2275_s21 }
  0x2a   :  { %2624 = sst [smem:[#allocation31_spill]] %s2280_s29 }
  0x2b   :  { %s2288_s14 = sld [smem:[%s2605_s0 + %s2125_s10]]   ;;  %s2129_s10 = smov 30   ;;  %v81_v0 = vstv %s1559_s25 }
  0x2c   :  { %s2293_s21 = sld [smem:[%s2605_s0 + %s2126_s16]]   ;;  %s2130_s16 = smov 31   ;;  %82 = vst [vmem:[#allocation2] sm:$0x1] %v81_v0 }
  0x2d   :  { %s2298_s29 = sld [smem:[%s2605_s0 + %s2127_s23]]   ;;  %s2131_s23 = smov 32  }
  0x2e   :  { %s2318_s28 = sld [smem:[%s2605_s0 + %s2131_s23]]   ;;  %s2134_s25 = smov 35  }
  0x2f   :  { %s2333_s22 = sld [smem:[%s2605_s0 + %s2134_s25]]   ;;  %s2135_s23 = smov 36  }
  0x31   :  { %2625 = sst [smem:[#allocation32_spill]] %s2288_s14 }
  0x32   :  { %2626 = sst [smem:[#allocation33_spill]] %s2293_s21 }
  0x33   :  { %2627 = sst [smem:[#allocation34_spill]] %s2298_s29  ;;  %s2136_s29 = smov 37  }
  0x34   :  { %s2308_s14 = sld [smem:[%s2605_s0 + %s2129_s10]]  }
  0x35   :  { %s2313_s21 = sld [smem:[%s2605_s0 + %s2130_s16]]  }
  0x36   :  { %2630 = sst [smem:[#allocation37_spill]] %s2318_s28 }
  0x37   :  { %s2323_s10 = sld [smem:[%s2605_s0 + %s2132_s1]]  }
  0x38   :  { %s2328_s16 = sld [smem:[%s2605_s0 + %s2133_s7]]  }
  0x39   :  { %s2338_s28 = sld [smem:[%s2605_s0 + %s2135_s23]]  }
  0x3a   :  { %2628 = sst [smem:[#allocation35_spill]] %s2308_s14 }
  0x3b   :  { %2629 = sst [smem:[#allocation36_spill]] %s2313_s21 }
  0x3d   :  { %2631 = sst [smem:[#allocation38_spill]] %s2323_s10 }
  0x3e   :  { %s2343_s10 = sld [smem:[%s2605_s0 + %s2136_s29]]  }
  0x3f   :  { %83 = vsyncpa [#allocation4], 0 }
  0x40   :  { %84 = vsyncpa [#allocation5], 0 }
  0x41   :  { %85 = vsyncpa [#allocation8], 0 }
  0x42   :  { %86 = vsyncpa [#allocation11], 0 }
  0x43   :  { %87 = vsyncpa [#allocation14], 0  ;;  %s2137_s14 = smov [#allocation3]   ;;  %s1936_s21 = scalar_lea.hbm %s2175_s17, 32 }
  0x44   :  { %s100_s7 = sshll.u32 %s2137_s14, 4  ;;  %p1937_p0 = scmp.ne.s32.totalorder %s2175_s17, %s1936_s21  ;;  %s101_s7 = int_to_ptr.vmem [resolvable:$true] %s100_s7 }
  0x45   :  { %p1940_p1 = scmp.lt.u32.totalorder %s1936_s21, %s2175_s17 }
  0x47   :  { %p1942_p2 = pnand %p1940_p1, %p1937_p0 }
  0x49   :  { %1945 = shalt.err (!%p1942_p2)
}
  0x4a   :  { %s1946_s11 = scalar_lea.vmem %s101_s7, 32  ;;  %p1951_p4 = scmp.lt.s32.totalorder %s101_s7, %s101_s7 }
  0x4b   :  { %p1947_p3 = scmp.ne.s32.totalorder %s101_s7, %s1946_s11  ;;  %p1952_p5 = scmp.lt.s32.totalorder %s1946_s11, %s1946_s11 }
  0x4d   :  { %p1953_p6 = por %p1952_p5, %p1951_p4 }
  0x4f   :  { %p1954_p7 = pnand %p1953_p6, %p1947_p3 }
  0x51   :  { %1957 = shalt.err (!%p1954_p7)
}
  0x52   :  { %103 = dma.hbm_to_vmem [thread:$0]  %s2175_s17, 32, %s101_s7, [#allocation4]  }
  0x53   :  { %2090 = dma.done.wait [#allocation4], 32  }
  0x54   :  { %2091 = vsyncadd [#allocation4], 4294967264  ;;  %v2138_v1 = vmov 0   ;;  %v2139_v2 = vmov 0.0|0.0   ;;  %v161_v3 = vld [vmem:[%s2160_s5] sm:$0x3]  ;;  %v162_v18 = vlaneseq }
  0x55   :  { %1902 = vset.pattern.permute.xlu0 %v2138_v1  ;;  %1781 = vmatprep.subr.bf16.mxu0 %v2139_v2  ;;  %v170_v4 = vld [vmem:[%s2165_s9] sm:$0xff]  ;;  %v171_v5 = vld [vmem:[%s2165_s9 + $0x8] sm:$0xff]  ;;  %v172_v7 = vld [vmem:[%s2165_s9 + $0x10] sm:$0xff]  ;;  %vm2140_vm0 = vmmov 0   ;;  %v2141_v9 = vmov 0.0   ;;  %vm181_vm1 = vcmask 1041408  }
  0x56   :  { %1790 = vmatprep.subr.bf16.mxu1 %v2139_v2  ;;  %1903 = vset.pattern.permute.xlu1 %v2138_v1  ;;  %v1782_v6 = vpack.c.bf16 %v171_v5, %v170_v4  ;;  %v173_v8 = vld [vmem:[%s2165_s9 + $0x18] sm:$0xff]  ;;  %v264_v11 = vld [vmem:[%s2215_s24] sm:$0xff]  ;;  %v265_v12 = vld [vmem:[%s2215_s24 + $0x8] sm:$0xff]  ;;  %v2371_v19 = vand.u32 127, %v162_v18  ;;  %vm177_vm2 = vcmask 408576   ;;  %vm266_vm4 = vcmask 130048  }
  0x57   :  { %165 = vperm.xlu0 %1902, %v161_v3   ;;  %1671 = vmatprep.mubr.msk.f32.mxu0 %vm2140_vm0, %v2141_v9  ;;  %v1785_v10 = vpack.c.bf16 %v173_v8, %v172_v7  ;;  %v174_v13 = vld [vmem:[%s2165_s9 + $0x20] sm:$0xff]  ;;  %v175_v14 = vld [vmem:[%s2165_s9 + $0x28] sm:$0xff]  ;;  %v1791_v15 = vpack.c.bf16 %v265_v12, %v264_v11  ;;  %v176_v17 = vld [vmem:[%s2165_s9 + $0x30] sm:$0x3]  ;;  %vm340_vm5 = vcmask 523264   ;;  %vm430_vm6 = vcmask 261120  }
  0x58   :  { %1678 = vmatprep.mubr.msk.f32.mxu1 %vm2140_vm0, %v2141_v9  ;;  %1783 = vmatpush3.bf16.msra.mxu0 %v1782_v6  ;;  %v1788_v16 = vpack.c.bf16 %v175_v14, %v174_v13  ;;  %v256_v22 = vld [vmem:[%s2210_s19] sm:$0xff]  ;;  %v257_v23 = vld [vmem:[%s2210_s19 + $0x8] sm:$0xff]  ;;  %v258_v25 = vld [vmem:[%s2210_s19 + $0x10] sm:$0xff]  ;;  %s2142_s0 = smov 32   ;;  %s2143_s5 = smov 64   ;;  %vm1056_vm7 = vcmask 254976  }
  0x59   :  { %1784 = vmatprep.subr.bf16.mxu0 %v2139_v2  ;;  %1792 = vmatpush3.bf16.msra.mxu1 %v1791_v15  ;;  %v1794_v24 = vpack.c.bf16 %v257_v23, %v256_v22  ;;  %v259_v26 = vld [vmem:[%s2210_s19 + $0x18] sm:$0xff]  ;;  %v260_v30 = vld [vmem:[%s2210_s19 + $0x20] sm:$0xff]  ;;  %v261_v31 = vld [vmem:[%s2210_s19 + $0x28] sm:$0xff]  ;;  %s2144_s9 = smov 96   ;;  %s2633_s17 = sld [smem:[#allocation32_spill]]  ;;  %vm869_vm8 = vcmask 1041409  }
  0x5a   :  { %1793 = vmatprep.subr.bf16.mxu1 %v2139_v2  ;;  %v1797_v29 = vpack.c.bf16 %v259_v26, %v258_v25  ;;  %v1800_v32 = vpack.c.bf16 %v261_v31, %v260_v30  ;;  %v262_v33 = vld [vmem:[%s2210_s19 + $0x30] sm:$0xff]  ;;  %v263_v34 = vld [vmem:[%s2210_s19 + $0x38] sm:$0xff]  ;;  %v255_v36 = vld [vmem:[%s2195_s3] sm:$0x3]  ;;  %s2634_s3 = sld [smem:[#allocation25_spill]]  ;;  %s2635_s19 = sld [smem:[#allocation26_spill]] }
  0x5b   :  { %v1803_v35 = vpack.c.bf16 %v263_v34, %v262_v33  ;;  %v426_v37 = vld [vmem:[%s2230_s12] sm:$0xff]  ;;  %v427_v38 = vld [vmem:[%s2230_s12 + $0x8] sm:$0xff]  ;;  %v428_v40 = vld [vmem:[%s2230_s12 + $0x10] sm:$0xff]  ;;  %s2636_s24 = sld [smem:[#allocation21_spill]]  ;;  %vm872_vm9 = vcmask 58368   ;;  %s2643_s25 = sld [smem:[#allocation31_spill]] }
  0x5c   :  { %1786 = vmatpush3.bf16.msra.mxu0 %v1785_v10  ;;  %v1806_v39 = vpack.c.bf16 %v427_v38, %v426_v37  ;;  %v429_v41 = vld [vmem:[%s2230_s12 + $0x18] sm:$0xff]  ;;  %v424_v43 = vld [vmem:[%s2225_s6] sm:$0xff]  ;;  %v425_v44 = vld [vmem:[%s2225_s6 + $0x8] sm:$0xff]  ;;  %s2638_s6 = sld [smem:[#allocation22_spill]]  ;;  %s2639_s12 = sld [smem:[#allocation29_spill]]  ;;  %vm1087_vm10 = vcmask 123904  }
  0x5d   :  { %1787 = vmatprep.subr.bf16.mxu0 %v2139_v2  ;;  %v1809_v42 = vpack.c.bf16 %v429_v41, %v428_v40  ;;  %v1812_v45 = vpack.c.bf16 %v425_v44, %v424_v43  ;;  %v422_v46 = vld [vmem:[%s2170_s13] sm:$0x3]  ;;  %v618_v7 = vld [vmem:[%s2245_s4 + $0x8] sm:$0xff]  ;;  %v619_v8 = vld [vmem:[%s2245_s4 + $0x10] sm:$0xff]  ;;  %s2632_s13 = sld [smem:[#allocation23_spill]]  ;;  %s2644_s15 = sld [smem:[#allocation28_spill]] }
  0x5e   :  { %v423_v47 = vld [vmem:[#allocation3] sm:$0x3]  ;;  %v1577_v51 = vld [vmem:[%s2220_s30] ss:$0 sm:$0xff]  ;;  %v620_v11 = vld [vmem:[%s2245_s4 + $0x18] sm:$0xff]  ;;  %s2637_s30 = sld [smem:[#allocation27_spill]] }
  0x5f   :  { %593 = vrot.lane.b32.xlu1 %v423_v47, %s2142_s0  ;;  %v1580_v58 = vld [vmem:[%s2235_s20] ss:$0 sm:$0xff]  ;;  %v1818_v12 = vpack.c.bf16 %v620_v11, %v619_v8  ;;  %v616_v23 = vld [vmem:[%s2240_s27 + $0x18] sm:$0xff]  ;;  %v1108_v37 = vld [vmem:[%s2633_s17 + $0x10] sm:$0xff]  ;;  %v2145_v43 = vmov 1966171168  }
  0x60   :  { %1789 = vmatpush3.bf16.msra.mxu0 %v1788_v16  ;;  %v617_v6 = vld [vmem:[%s2245_s4] sm:$0xff]  ;;  %v1109_v38 = vld [vmem:[%s2633_s17 + $0x18] sm:$0xff]  ;;  %v784_v44 = vunpack.c.l.s4 %v2145_v43  ;;  %s2640_s20 = sld [smem:[#allocation33_spill]]  ;;  %s2642_s4 = sld [smem:[#allocation20_spill]]  ;;  %vm1038_vm11 = vcmask 517120   ;;  %vm1445_vm12 = vcmask 1024  }
  0x61   :  { %1669 = vmatprep.subr.mxu0 %v2141_v9  ;;  %v1815_v10 = vpack.c.bf16 %v618_v7, %v617_v6  ;;  %v1842_v40 = vpack.c.bf16 %v1109_v38, %v1108_v37  ;;  %v1584_v47 = vld [vmem:[%s2634_s3] ss:$0 sm:$0xff]  ;;  %s2645_s18 = sld [smem:[#allocation34_spill]]  ;;  %s2646_s23 = sld [smem:[#allocation24_spill]]  ;;  %vm1355_vm13 = vcmask 435200  }
  0x62   :  { %s2147_s29 = smov [#allocation10]  }
  0x63   :  { %s1484_s1 = sshll.u32 %s2147_s29, 4  ;;  %s1485_s1 = int_to_ptr.vmem [resolvable:$true] %s1484_s1 }
  0x64   :  { %1670 = vmatpush3.msk.msra.mxu0 %vm181_vm1, %v176_v17  ;;  %v613_v17 = vld [vmem:[%s2240_s27] sm:$0xff] }
  0x65   :  { %1805 = vmatprep.subr.bf16.mxu0 %v2139_v2 }
  0xd1   :  { %v594_v13 = vpop.permute.xlu1 %593 }
  0xd6   :  { %v166_v20 = vpop.permute.xlu0 %165 }
  0xd7   :  { %vm167_vm3 = vcmp.eq.s32.totalorder %v166_v20, %v2371_v19  ;;  %v614_v20 = vld [vmem:[%s2240_s27 + $0x8] sm:$0xff] }
  0xd8   :  { %v1572_v21 = vsel %vm167_vm3, 1.0, %v2141_v9  ;;  %v1821_v22 = vpack.c.bf16 %v614_v20, %v613_v17 }
  0xd9   :  { %1672 = vmatmul.mubr.msk.f32.vlgmr.msra.gmra.mrb[0].mxu0 %vm177_vm2, %v1572_v21  ;;  %v615_v21 = vld [vmem:[%s2240_s27 + $0x10] sm:$0xff]  ;;  %s2641_s27 = sld [smem:[#allocation30_spill]] }
  0xda   :  { %1708 = vmatprep.mubr.msk.f32.mxu0 %vm2140_vm0, %v2141_v9  ;;  %1807 = vmatpush3.bf16.msra.mxu0 %v1806_v39 }
  0xdb   :  { %1808 = vmatprep.subr.bf16.mxu0 %v2139_v2 }
  0xde   :  { %1810 = vmatpush3.bf16.msra.mxu0 %v1809_v42 }
  0xdf   :  { %1814 = vmatprep.subr.bf16.mxu0 %v2139_v2 }
  0xe1   :  { %1709 = vmatmul.mubr.msk.f32.vlgmr.msra.gmra.mrb[2].mxu0 %vm430_vm6, %v422_v46 }
  0xe2   :  { %1726 = vmatprep.mubr.msk.f32.mxu0 %vm2140_vm0, %v2141_v9  ;;  %1816 = vmatpush3.bf16.msra.mxu0 %v1815_v10  ;;  %v1586_v10 = vld [vmem:[%s2637_s30] ss:$0 sm:$0xff] }
  0xe3   :  { %1817 = vmatprep.subr.bf16.mxu0 %v2139_v2 }
  0xe6   :  { %1819 = vmatpush3.bf16.msra.mxu0 %v1818_v12 }
  0xe7   :  { %1826 = vmatprep.subr.bf16.mxu0 %v2139_v2 }
 0x1ac   :  { %v251_v27 = vpop.f32.mrb[0].mxu0 }
 0x1ad   :  { %v1673_v28 = vpop.f32.mrb[1].mxu0  ;;  %1679 = vmatmul.mubr.msk.f32.vlgmr.msra.gmra.mrb[0].mxu1 %vm266_vm4, %v251_v27 }
 0x1ae   :  { %1795 = vmatpush3.bf16.msra.mxu1 %v1794_v24  ;;  %1697 = vmatprep.mubr.msk.f32.mxu1 %vm2140_vm0, %v2141_v9  ;;  %v1824_v24 = vpack.c.bf16 %v616_v23, %v615_v21 }
 0x1af   :  { %1796 = vmatprep.subr.bf16.mxu1 %v2139_v2 }
 0x1b2   :  { %1798 = vmatpush3.bf16.msra.mxu1 %v1797_v29  ;;  %v2447_v29 = vshrl.u32 %v162_v18, 7 }
 0x1b3   :  { %1799 = vmatprep.subr.bf16.mxu1 %v2139_v2 }
 0x1b4   :  { %v500_v55 = vpop.f32.mrb[2].mxu0  ;;  %v2450_v30 = vsub.s32 0, %v2447_v29  ;;  %v2453_v31 = vsub.s32 1, %v2447_v29  ;;  %v2489_v20 = vsub.s32 %v2371_v19, %v2447_v29 }
 0x1b5   :  { %v1710_v56 = vpop.f32.mrb[3].mxu0 }
 0x1b6   :  { %1801 = vmatpush3.bf16.msra.mxu1 %v1800_v32  ;;  %v2456_v32 = vld [vmem:[%s2632_s13] sm:$0x3] }
 0x1b7   :  { %1802 = vmatprep.subr.bf16.mxu1 %v2139_v2  ;;  %v820_v33 = vrot.slane %v2456_v32, %v2450_v30  ;;  %v827_v34 = vrot.slane %v2456_v32, %v2453_v31 }
 0x1ba   :  { %1804 = vmatpush3.bf16.msra.mxu1 %v1803_v35  ;;  %v1106_v35 = vld [vmem:[%s2633_s17] sm:$0xff] }
 0x1bb   :  { %1811 = vmatprep.subr.bf16.mxu1 %v2139_v2 }
 0x1bd   :  { %1698 = vmatmul.mubr.msk.f32.vlgmr.msra.gmra.mrb[2].mxu1 %vm340_vm5, %v255_v36  ;;  %v1107_v36 = vld [vmem:[%s2633_s17 + $0x8] sm:$0xff] }
 0x1be   :  { %1715 = vmatprep.mubr.msk.f32.mxu1 %vm2140_vm0, %v2141_v9  ;;  %1813 = vmatpush3.bf16.msra.mxu1 %v1812_v45  ;;  %v1839_v18 = vpack.c.bf16 %v1107_v36, %v1106_v35  ;;  %v785_v45 = vunpack.c.0.s8 %v784_v44 }
 0x1bf   :  { %1820 = vmatprep.subr.bf16.mxu1 %v2139_v2 }
 0x280   :  { %v336_v48 = vpop.f32.mrb[0].mxu1 }
 0x281   :  { %v1680_v49 = vpop.f32.mrb[1].mxu1 }
 0x282   :  { %v788_v49 = vsub.s32 %v785_v45, %v2447_v29 }
 0x290   :  { %v410_v50 = vpop.f32.mrb[2].mxu1 }
 0x291   :  { %v411_v52 = vadd.f32 %v410_v50, %v336_v48  ;;  %v1699_v53 = vpop.f32.mrb[3].mxu1 }
 0x292   :  { %v1585_v53 = vld [vmem:[%s2635_s19] ss:$0 sm:$0xff] }
 0x293   :  { %v2411_v54 = vadd.f32 %v1577_v51, %v411_v52 }
 0x295   :  { %1716 = vmatmul.mubr.msk.f32.vlgmr.msra.gmra.mrb[4].mxu1 %vm266_vm4, %v2411_v54 }
 0x296   :  { %1737 = vmatprep.mubr.msk.f32.mxu1 %vm2140_vm0, %v2141_v9  ;;  %1822 = vmatpush3.bf16.msra.mxu1 %v1821_v22 }
 0x297   :  { %1823 = vmatprep.subr.bf16.mxu1 %v2139_v2 }
 0x29a   :  { %1825 = vmatpush3.bf16.msra.mxu1 %v1824_v24 }
 0x29b   :  { %1838 = vmatprep.subr.bf16.mxu1 %v2139_v2 }
 0x368   :  { %v573_v57 = vpop.f32.mrb[4].mxu1 }
 0x369   :  { %v574_v59 = vadd.f32 %v573_v57, %v500_v55  ;;  %v1717_v60 = vpop.f32.mrb[5].mxu1 }
 0x36b   :  { %v584_v61 = vadd.f32 %v1580_v58, %v574_v59  ;;  %v780_v59 = vld [vmem:[%s2636_s24] sm:$0xff] }
 0x36d   :  { %1904 = vtanh.f32 %v584_v61  ;;  %v1581_v63 = vmul.f32 -1.442695, %v584_v61 }
 0x36f   :  { %1906 = vpow2.f32 %v1581_v63 }
 0x377   :  { %v1905_v62 = vpop.eup %1904 }
 0x378   :  { %598 = vrot.lane.b32.xlu0 %v1905_v62, %s2143_s5 }
 0x379   :  { %v1907_v0 = vpop.eup %1906 }
 0x37a   :  { %v588_v1 = vadd.f32 1.0, %v1907_v0 }
 0x37c   :  { %1908 = vrcp.f32 %v588_v1  ;;  %v781_v1 = vld [vmem:[%s2636_s24 + $0x8] sm:$0xff] }
 0x386   :  { %v1909_v3 = vpop.eup %1908 }
 0x387   :  { %v596_v14 = vmul.f32 %v1909_v3, %v594_v13 }
 0x3ea   :  { %v599_v4 = vpop.permute.xlu0 %598 }
 0x3eb   :  { %v601_v5 = vmul.f32 %v1909_v3, %v599_v4 }
 0x3ed   :  { %603 = vrot.lane.b32.xlu1 %v601_v5, %s2142_s0 }
 0x45f   :  { %v604_v15 = vpop.permute.xlu1 %603 }
 0x460   :  { %v2426_v16 = vadd.f32 %v604_v15, %v596_v14 }
 0x462   :  { %1910 = vtanh.f32 %v2426_v16  ;;  %622 = vrot.lane.b32.xlu1 %v2426_v16, %s2144_s9 }
 0x466   :  { %822 = vbcast.lane.b32.xlu1 %v820_v33, 256 }
 0x46c   :  { %v1911_v25 = vpop.eup %1910 }
 0x46d   :  { %609 = vrot.lane.b32.xlu0 %v1911_v25, %s2143_s5 }
 0x4d4   :  { %v623_v26 = vpop.permute.xlu1 %622 }
 0x4d5   :  { %1441 = vst.msk [vmem:[#allocation9] sm:$0x3] %vm1056_vm7, %v623_v26  ;;  %1727 = vmatmul.mubr.msk.f32.vlgmr.msra.gmra.mrb[4].mxu0 %vm430_vm6, %v623_v26 }
 0x4d6   :  { %1756 = vmatprep.mubr.msk.f32.mxu0 %vm2140_vm0, %v2141_v9 }
 0x4d8   :  { %v823_v55 = vpop.permute.xlu1 %822 }
 0x4d9   :  { %v838_v63 = vmul.f32 %v1585_v53, %v823_v55 }
 0x4df   :  { %v610_v27 = vpop.permute.xlu0 %609 }
 0x4e0   :  { %v2442_v28 = vmul.f32 %v1909_v3, %v610_v27 }
 0x4e2   :  { %697 = vrot.lane.b32.xlu0 %v2442_v28, %s2142_s0 }
 0x4e6   :  { %829 = vbcast.lane.b32.xlu0 %v827_v34, 256 }
 0x554   :  { %v698_v39 = vpop.permute.xlu0 %697 }
 0x555   :  { %1439 = vst.msk [vmem:[#allocation7] sm:$0x3] %vm1056_vm7, %v698_v39  ;;  %1738 = vmatmul.mubr.msk.f32.vlgmr.msra.gmra.mrb[6].mxu1 %vm430_vm6, %v698_v39 }
 0x556   :  { %1840 = vmatpush3.bf16.msra.mxu1 %v1839_v18  ;;  %1767 = vmatprep.mubr.msk.f32.mxu1 %vm2140_vm0, %v2141_v9 }
 0x557   :  { %1841 = vmatprep.subr.bf16.mxu1 %v2139_v2 }
 0x558   :  { %v830_v60 = vpop.permute.xlu0 %829 }
 0x559   :  { %v839_v5 = vmul.f32 %v1585_v53, %v830_v60 }
 0x55a   :  { %1843 = vmatpush3.bf16.msra.mxu1 %v1842_v40 }
 0x55b   :  { %1844 = vmatprep.subr.bf16.mxu1 %v2139_v2 }
 0x55d   :  { %1768 = vmatmul.mubr.msk.f32.vlgmr.msra.gmra.mrb[8].mxu1 %vm430_vm6, %v698_v39  ;;  %v929_v39 = vld [vmem:[%s2638_s6] sm:$0x3] }
 0x55e   :  { %1778 = vmatprep.mubr.msk.f32.mxu1 %vm2140_vm0, %v2141_v9  ;;  %v934_v40 = vrot.slane %v929_v39, %v2450_v30 }
 0x5a8   :  { %v692_v41 = vpop.f32.mrb[4].mxu0 }
 0x5a9   :  { %v1728_v42 = vpop.f32.mrb[5].mxu0 }
 0x628   :  { %v767_v46 = vpop.f32.mrb[6].mxu1 }
 0x629   :  { %v768_v48 = vadd.f32 %v767_v46, %v692_v41  ;;  %v1739_v50 = vpop.f32.mrb[7].mxu1  ;;  %v941_v41 = vrot.slane %v929_v39, %v2453_v31 }
 0x62b   :  { %v778_v51 = vadd.f32 %v1584_v47, %v768_v48 }
 0x62d   :  { %v789_v52 = vrot.slane %v778_v51, %v788_v49 }
 0x62f   :  { %v790_v56 = vcombine.high %v789_v52, %v789_v52  ;;  %v797_v57 = vrot.slane %v789_v52, %v788_v49 }
 0x630   :  { %v2478_v58 = vpop.f32.mrb[8].mxu1 }
 0x631   :  { %v1769_v61 = vpop.f32.mrb[9].mxu1  ;;  %v808_v62 = vrot.slane %v797_v57, %v2450_v30  ;;  %v804_v0 = vrot.slane %v790_v56, %v788_v49 }
 0x633   :  { %v815_v3 = vadd.f32 %v808_v62, %v780_v59  ;;  %v812_v4 = vrot.slane %v804_v0, %v2450_v30 }
 0x635   :  { %v840_v6 = vadd.f32 %v838_v63, %v815_v3  ;;  %v816_v7 = vadd.f32 %v812_v4, %v781_v1  ;;  %v1588_v4 = vld [vmem:[%s2639_s12] ss:$0 sm:$0xff] }
 0x637   :  { %1912 = vtanh.f32 %v840_v6  ;;  %v841_v8 = vadd.f32 %v839_v5, %v816_v7 }
 0x639   :  { %1914 = vtanh.f32 %v841_v8 }
 0x641   :  { %v1913_v11 = vpop.eup %1912 }
 0x642   :  { %v851_v12 = vmul.f32 %v1913_v11, %v1586_v10 }
 0x643   :  { %v1915_v13 = vpop.eup %1914 }
 0x644   :  { %v853_v14 = vsel %vm340_vm5, %v851_v12, 0.0  ;;  %v852_v15 = vmul.f32 %v1915_v13, %v1586_v10  ;;  %v1110_v13 = vld [vmem:[%s2640_s20] sm:$0xff] }
 0x645   :  { %854 = vadd.xlane.f32.xlu1 %v853_v14  ;;  %v1111_v14 = vld [vmem:[%s2640_s20 + $0x8] sm:$0xff] }
 0x646   :  { %v856_v17 = vsel %vm340_vm5, %v852_v15, 0.0  ;;  %v1827_v15 = vpack.c.bf16 %v1111_v14, %v1110_v13 }
 0x647   :  { %857 = vadd.xlane.f32.xlu0 %v856_v17  ;;  %v1589_v17 = vld [vmem:[%s2641_s27] ss:$0 sm:$0xff] }
 0x648   :  { %1828 = vmatpush3.bf16.msra.mxu0 %v1827_v15 }
 0x649   :  { %1829 = vmatprep.subr.bf16.mxu0 %v2139_v2 }
 0x6d2   :  { %v855_v21 = vpop.xlane.xlu1 %854 }
 0x6d3   :  { %v864_v23 = vrot.slane %v855_v21, %v2489_v20 }
 0x6d4   :  { %v858_v22 = vpop.xlane.xlu0 %857 }
 0x6d5   :  { %v868_v24 = vrot.slane %v858_v22, %v2489_v20 }
 0x6d7   :  { %v870_v25 = vsel %vm869_vm8, %v868_v24, %v864_v23  ;;  %v1113_v23 = vld [vmem:[%s2640_s20 + $0x18] sm:$0xff] }
 0x6d8   :  { %v873_v26 = vsel %vm872_vm9, %v870_v25, -inf }
 0x6d9   :  { %874 = vmax.xlane.f32.xlu0 %v873_v26  ;;  %v1114_v26 = vld [vmem:[%s2640_s20 + $0x20] sm:$0xff] }
 0x766   :  { %v875_v27 = vpop.xlane.xlu0 %874 }
 0x767   :  { %v880_v33 = vrot.slane %v875_v27, %v2450_v30  ;;  %v884_v29 = vrot.slane %v875_v27, %v2453_v31  ;;  %v1115_v27 = vld [vmem:[%s2640_s20 + $0x28] sm:$0xff] }
 0x769   :  { %v887_v34 = vsub.f32 %v855_v21, %v880_v33  ;;  %v888_v35 = vsub.f32 %v858_v22, %v884_v29  ;;  %v1112_v22 = vld [vmem:[%s2640_s20 + $0x10] sm:$0xff]  ;;  %v1833_v33 = vpack.c.bf16 %v1115_v27, %v1114_v26 }
 0x76a   :  { %v1830_v24 = vpack.c.bf16 %v1113_v23, %v1112_v22  ;;  %v1116_v29 = vld [vmem:[%s2640_s20 + $0x30] sm:$0xff] }
 0x76b   :  { %v889_v36 = vmul.f32 1.442695, %v887_v34  ;;  %v891_v18 = vmul.f32 1.442695, %v888_v35  ;;  %v1117_v34 = vld [vmem:[%s2640_s20 + $0x38] sm:$0xff] }
 0x76c   :  { %1831 = vmatpush3.bf16.msra.mxu0 %v1830_v24  ;;  %v1836_v35 = vpack.c.bf16 %v1117_v34, %v1116_v29  ;;  %v1591_v34 = vld [vmem:[#allocation2] ss:$0 sm:$0xff] }
 0x76d   :  { %1916 = vpow2.f32 %v889_v36  ;;  %1832 = vmatprep.subr.bf16.mxu0 %v2139_v2  ;;  %v985_v36 = vld [vmem:[%s2642_s4] sm:$0xff] }
 0x76e   :  { %1918 = vpow2.f32 %v891_v18 }
 0x770   :  { %1834 = vmatpush3.bf16.msra.mxu0 %v1833_v33 }
 0x771   :  { %1835 = vmatprep.subr.bf16.mxu0 %v2139_v2 }
 0x774   :  { %1837 = vmatpush3.bf16.msra.mxu0 %v1836_v35 }
 0x777   :  { %v1917_v37 = vpop.eup %1916 }
 0x778   :  { %v1919_v38 = vpop.eup %1918  ;;  %896 = vperm.xlu1 %1903, %v1917_v37  }
 0x779   :  { %899 = vperm.xlu0 %1902, %v1919_v38  }
 0x77d   :  { %936 = vbcast.lane.b32.xlu0 %v934_v40, 256 }
 0x781   :  { %943 = vbcast.lane.b32.xlu0 %v941_v41, 256 }
 0x7f7   :  { %v897_v42 = vpop.permute.xlu1 %896 }
 0x7f8   :  { %v900_v43 = vpop.permute.xlu0 %899  ;;  %v904_v44 = vrot.slane %v897_v42, %v2489_v20 }
 0x7f9   :  { %v908_v45 = vrot.slane %v900_v43, %v2489_v20 }
 0x7fb   :  { %v909_v46 = vsel %vm869_vm8, %v908_v45, %v904_v44 }
 0x7fc   :  { %v911_v47 = vsel %vm872_vm9, %v909_v46, 0.0  ;;  %v937_v51 = vpop.permute.xlu0 %936 }
 0x7fd   :  { %912 = vadd.xlane.f32.xlu1 %v911_v47 }
 0x800   :  { %v944_v59 = vpop.permute.xlu0 %943 }
 0x88a   :  { %v913_v48 = vpop.xlane.xlu1 %912 }
 0x88b   :  { %v918_v49 = vrot.slane %v913_v48, %v2450_v30  ;;  %v922_v50 = vrot.slane %v913_v48, %v2453_v31 }
 0x88d   :  { %1920 = vrcp.f32 %v918_v49 }
 0x88e   :  { %1922 = vrcp.f32 %v922_v50 }
 0x897   :  { %v1921_v52 = vpop.eup %1920 }
 0x898   :  { %v1923_v53 = vpop.eup %1922  ;;  %v926_v55 = vmul.f32 %v1921_v52, %v1917_v37 }
 0x899   :  { %v928_v57 = vmul.f32 %v1923_v53, %v1919_v38 }
 0x89a   :  { %v947_v56 = vmul.f32 %v937_v51, %v926_v55 }
 0x89b   :  { %v948_v60 = vmul.f32 %v944_v59, %v928_v57 }
 0x89c   :  { %952 = vperm.xlu0 %1902, %v947_v56  }
 0x8a0   :  { %955 = vperm.xlu0 %1902, %v948_v60  }
 0x91b   :  { %v953_v61 = vpop.permute.xlu0 %952 }
 0x91c   :  { %v960_v63 = vrot.slane %v953_v61, %v2489_v20 }
 0x91f   :  { %v956_v62 = vpop.permute.xlu0 %955 }
 0x920   :  { %v964_v0 = vrot.slane %v956_v62, %v2489_v20 }
 0x922   :  { %v965_v1 = vsel %vm869_vm8, %v964_v0, %v960_v63 }
 0x923   :  { %v967_v3 = vsel %vm872_vm9, %v965_v1, 0.0 }
 0x924   :  { %968 = vadd.xlane.f32.xlu0 %v967_v3 }
 0x93a   :  { %1048 = vrot.lane.b32.xlu0 %v1588_v4, %s2144_s9 }
 0x9b1   :  { %v969_v5 = vpop.xlane.xlu0 %968 }
 0x9b2   :  { %v974_v6 = vrot.slane %v969_v5, %v2450_v30  ;;  %v978_v7 = vrot.slane %v969_v5, %v2453_v31 }
 0x9b4   :  { %1924 = vrcp.f32 %v974_v6 }
 0x9b5   :  { %1926 = vrcp.f32 %v978_v7  ;;  %v1049_v21 = vpop.permute.xlu0 %1048  ;;  %v1271_v7 = vld [vmem:[%s2303_s8] sm:$0xff] }
 0x9b6   :  { %v1051_v25 = vmul.f32 %v1049_v21, %v2442_v28  ;;  %v986_v28 = vld [vmem:[%s2642_s4 + $0x8] sm:$0xff]  ;;  %v1595_v21 = vld [vmem:[%s2645_s18] ss:$0 sm:$0xff] }
 0x9be   :  { %v1925_v8 = vpop.eup %1924 }
 0x9bf   :  { %v982_v10 = vmul.f32 %v1925_v8, %v947_v56  ;;  %v1927_v11 = vpop.eup %1926  ;;  %v1272_v8 = vld [vmem:[%s2303_s8 + $0x8] sm:$0xff] }
 0x9c0   :  { %v984_v12 = vmul.f32 %v1927_v11, %v948_v60  ;;  %v1273_v11 = vld [vmem:[%s2303_s8 + $0x10] sm:$0xff] }
 0x9c1   :  { %989 = vperm.xlu1 %1903, %v982_v10   ;;  %v1845_v10 = vpack.c.bf16 %v1272_v8, %v1271_v7 }
 0x9c3   :  { %1846 = vmatpush3.bf16.msra.mxu1 %v1845_v10 }
 0x9c4   :  { %1847 = vmatprep.subr.bf16.mxu1 %v2139_v2 }
 0x9c5   :  { %994 = vperm.xlu1 %1903, %v984_v12   ;;  %v1274_v12 = vld [vmem:[%s2303_s8 + $0x18] sm:$0xff]  ;;  %s2647_s8 = sld [smem:[#allocation35_spill]] }
 0x9c6   :  { %v1848_v13 = vpack.c.bf16 %v1274_v12, %v1273_v11 }
 0x9c8   :  { %1849 = vmatpush3.bf16.msra.mxu1 %v1848_v13 }
 0x9c9   :  { %1067 = vrot.lane.b32.xlu1 %v1589_v17, %s2142_s0 }
 0x9cd   :  { %1053 = vrot.lane.b32.xlu1 %v1051_v25, %s2142_s0 }
 0xa40   :  { %v990_v18 = vpop.permute.xlu1 %989 }
 0xa41   :  { %v997_v37 = vmul.f32 %v990_v18, %v985_v36  ;;  %v1016_v41 = vrot.slane %v990_v18, %v2489_v20 }
 0xa43   :  { %v999_v38 = vsel %vm340_vm5, %v997_v37, 0.0 }
 0xa44   :  { %v1000_v39 = vrot.slane %v999_v38, 4  ;;  %v995_v40 = vpop.permute.xlu1 %994 }
 0xa45   :  { %v998_v42 = vmul.f32 %v995_v40, %v986_v28  ;;  %v1020_v43 = vrot.slane %v995_v40, %v2489_v20  ;;  %v1590_v20 = vld [vmem:[%s2643_s25] ss:$0 sm:$0xff] }
 0xa46   :  { %v1001_v44 = vadd.f32 %v1000_v39, %v999_v38  ;;  %v1086_v59 = vmul.f32 %v1590_v20, %v2411_v54  ;;  %v1587_v54 = vld [vmem:[%s2644_s15] ss:$0 sm:$0xff] }
 0xa47   :  { %v1006_v45 = vsel %vm340_vm5, %v998_v42, 0.0  ;;  %v2536_v46 = vsel %vm869_vm8, %v1020_v43, %v1016_v41  ;;  %v1380_v39 = vld [vmem:[%s2646_s23] sm:$0x3] }
 0xa48   :  { %v1002_v47 = vrot.slane %v1001_v44, 2  ;;  %v1007_v48 = vrot.slane %v1006_v45, 4  ;;  %v1068_v49 = vpop.permute.xlu1 %1067  ;;  %v1023_v50 = vadd.f32 %v2536_v46, %v2456_v32  ;;  %1444 = vst.msk [vmem:[#allocation12] sm:$0x3] %vm872_vm9, %v2536_v46  ;;  %v1391_v40 = vrot.slane %v1380_v39, %v2453_v31 }
 0xa49   :  { %v1070_v51 = vmul.f32 %v1068_v49, %v2426_v16  ;;  %v1088_v16 = vsel %vm1087_vm10, %v1086_v59, 0.0 }
 0xa4a   :  { %v1003_v52 = vadd.f32 %v1002_v47, %v1001_v44  ;;  %v1008_v53 = vadd.f32 %v1007_v48, %v1006_v45  ;;  %1447 = vst.msk [vmem:[#allocation13] sm:$0x3] %vm872_vm9, %v1023_v50  ;;  %v1596_v44 = vld [vmem:[%s2647_s8] ss:$0 sm:$0xff]  ;;  %v1384_v50 = vrot.slane %v1380_v39, %v2450_v30 }
 0xa4b   :  { %1072 = vrot.lane.b32.xlu1 %v1070_v51, %s2144_s9 }
 0xa4c   :  { %v1009_v55 = vrot.slane %v1008_v53, 2  ;;  %v1054_v56 = vpop.permute.xlu1 %1053  ;;  %v1004_v32 = vrot.slane %v1003_v52, 1 }
 0xa4d   :  { %v1057_v57 = vsel %vm1056_vm7, %v1054_v56, 0.0 }
 0xa4e   :  { %v1010_v60 = vadd.f32 %v1009_v55, %v1008_v53  ;;  %1058 = vadd.xlane.f32.xlu0 %v1057_v57  ;;  %v1005_v62 = vadd.f32 %v1004_v32, %v1003_v52 }
 0xa50   :  { %v1011_v61 = vrot.slane %v1010_v60, 1  ;;  %v1031_v4 = vmul.f32 %v1587_v54, %v1005_v62 }
 0xa52   :  { %v1012_v63 = vadd.f32 %v1011_v61, %v1010_v60  ;;  %1089 = vadd.xlane.f32.xlu0 %v1088_v16 }
 0xa54   :  { %v1120_v0 = vsel %vm869_vm8, %v1012_v63, %v1005_v62  ;;  %v1032_v1 = vmul.f32 %v1587_v54, %v1012_v63 }
 0xa55   :  { %1757 = vmatmul.mubr.msk.f32.vlgmr.msra.gmra.mrb[6].mxu0 %vm340_vm5, %v1120_v0  ;;  %1443 = vst.msk [vmem:[#allocation10] sm:$0x3] %vm1038_vm11, %v1120_v0 }
 0xa56   :  { %v1035_v3 = vrot.slane %v1032_v1, 7 }
 0xa58   :  { %v1036_v5 = vsel %vm869_vm8, %v1035_v3, %v1031_v4 }
 0xa59   :  { %v1039_v6 = vsel %vm1038_vm11, %v1036_v5, 0.0 }
 0xa6f   :  { %1040 = vadd.xlane.f32.xlu1 %v1039_v6 }
 0xabd   :  { %v1073_v14 = vpop.permute.xlu1 %1072 }
 0xabe   :  { %v1075_v15 = vsel %vm1056_vm7, %v1073_v14, 0.0 }
 0xabf   :  { %1076 = vadd.xlane.f32.xlu1 %v1075_v15 }
 0xadb   :  { %v1059_v25 = vpop.xlane.xlu0 %1058 }
 0xadf   :  { %v1090_v29 = vpop.xlane.xlu0 %1089 }
 0xafc   :  { %v1041_v26 = vpop.xlane.xlu1 %1040 }
 0xafd   :  { %v1060_v2 = vadd.f32 %v1059_v25, %v1041_v26 }
 0xb28   :  { %v1189_v17 = vpop.f32.mrb[6].mxu0 }
 0xb29   :  { %v1260_v22 = vadd.f32 %v2478_v58, %v1189_v17  ;;  %v1758_v23 = vpop.f32.mrb[7].mxu0 }
 0xb2b   :  { %v1270_v24 = vadd.f32 %v1595_v21, %v1260_v22 }
 0xb2d   :  { %1779 = vmatmul.mubr.msk.f32.vlgmr.msra.gmra.mrb[10].mxu1 %vm430_vm6, %v1270_v24 }
 0xb4c   :  { %v1077_v27 = vpop.xlane.xlu1 %1076 }
 0xb4d   :  { %v1078_v33 = vadd.f32 %v1077_v27, %v1060_v2 }
 0xb4f   :  { %v1091_v35 = vadd.f32 %v1090_v29, %v1078_v33 }
 0xb51   :  { %v1099_v36 = vadd.f32 %v1591_v34, %v1091_v35 }
 0xb53   :  { %v1592_v18 = vmul.f32 -1.442695, %v1099_v36 }
 0xb55   :  { %1928 = vpow2.f32 %v1592_v18 }
 0xb5f   :  { %v1929_v37 = vpop.eup %1928 }
 0xb60   :  { %v1103_v58 = vadd.f32 1.0, %v1929_v37 }
 0xb62   :  { %1930 = vrcp.f32 %v1103_v58 }
 0xb6c   :  { %v1931_v28 = vpop.eup %1930 }
 0xb6d   :  { %1446 = vst.msk [vmem:[%s2338_s28] sm:$0x3] %vm1445_vm12, %v1931_v28  ;;  %v1373_v38 = vsub.f32 1.0, %v1931_v28  ;;  %s2146_s28 = smov [#allocation7]  }
 0xb6e   :  { %s1464_s26 = sshll.u32 %s2146_s28, 4  ;;  %s1465_s26 = int_to_ptr.vmem [resolvable:$true] %s1464_s26 }
 0xb6f   :  { %1376 = vperm.xlu0 %1902, %v1373_v38   ;;  %s1958_s2 = scalar_lea.vmem %s1465_s26, 32  ;;  %p1963_p9 = scmp.lt.s32.totalorder %s1465_s26, %s1465_s26 }
 0xb70   :  { %p1959_p8 = scmp.ne.s32.totalorder %s1465_s26, %s1958_s2  ;;  %p1964_p10 = scmp.lt.s32.totalorder %s1958_s2, %s1958_s2 }
 0xb72   :  { %p1965_p11 = por %p1964_p10, %p1963_p9 }
 0xb73   :  { %1393 = vbcast.lane.b32.xlu0 %v1391_v40, 256 }
 0xb74   :  { %p1966_p12 = pnand %p1965_p11, %p1959_p8 }
 0xbee   :  { %v1377_v41 = vpop.permute.xlu0 %1376 }
 0xbef   :  { %v1379_v42 = vmul.f32 %v1377_v41, %v2536_v46 }
 0xbf1   :  { %v1411_v43 = vrot.slane %v1379_v42, %v2453_v31  ;;  %v1404_v51 = vrot.slane %v1379_v42, %v2450_v30 }
 0xbf3   :  { %1413 = vbcast.lane.b32.xlu0 %v1411_v43, 256 }
 0xc00   :  { %v1351_v45 = vpop.f32.mrb[10].mxu1 }
 0xc01   :  { %v1352_v47 = vadd.f32 %v1596_v44, %v1351_v45  ;;  %v1780_v48 = vpop.f32.mrb[11].mxu1 }
 0xc03   :  { %v1356_v49 = vsel %vm1355_vm13, %v1352_v47, -inf }
 0xc04   :  { %1357 = vmax.xlane.f32.xlu1 %v1356_v49 }
 0xc15   :  { %1386 = vbcast.lane.b32.xlu1 %v1384_v50, 256 }
 0xc19   :  { %1406 = vbcast.lane.b32.xlu1 %v1404_v51, 256 }
 0xc91   :  { %v1358_v52 = vpop.xlane.xlu1 %1357 }
 0xc92   :  { %v1359_v53 = vsub.f32 %v1352_v47, %v1358_v52 }
 0xc94   :  { %v1360_v46 = vmul.f32 1.442695, %v1359_v53 }
 0xc96   :  { %1932 = vpow2.f32 %v1360_v46 }
 0xca0   :  { %v2570_v31 = vpop.eup %1932 }
 0xca1   :  { %v1362_v20 = vsel %vm1355_vm13, %v2570_v31, 0.0 }
 0xca2   :  { %1363 = vadd.xlane.f32.xlu1 %v1362_v20 }
 0xcb3   :  { %1369 = vperm.xlu1 %1903, %v1931_v28  }
 0xcb4   :  { %1969 = shalt.err (!%p1966_p12)
}
 0xcb5   :  { %s2648_s14 = sld [smem:[#allocation37_spill]] }
 0xcbb   :  { %s1970_s7 = scalar_lea.hbm %s2648_s14, 32 }
 0xcbc   :  { %p1971_p13 = scmp.ne.s32.totalorder %s2648_s14, %s1970_s7  ;;  %p1974_p0 = scmp.lt.u32.totalorder %s1970_s7, %s2648_s14 }
 0xcbe   :  { %p1976_p1 = pnand %p1974_p0, %p1971_p13 }
 0xcc0   :  { %1979 = shalt.err (!%p1976_p1)
}
 0xcc1   :  { %1467 = dma.vmem_to_hbm [thread:$0]  %s1465_s26, 32, %s2648_s14, [#allocation8]  }
 0xcc2   :  { %s1980_s21 = scalar_lea.vmem %s1485_s1, 32  ;;  %p1985_p3 = scmp.lt.s32.totalorder %s1485_s1, %s1485_s1 }
 0xcc3   :  { %p1981_p2 = scmp.ne.s32.totalorder %s1485_s1, %s1980_s21  ;;  %p1986_p4 = scmp.lt.s32.totalorder %s1980_s21, %s1980_s21 }
 0xcc5   :  { %p1987_p5 = por %p1986_p4, %p1985_p3 }
 0xcc7   :  { %p1988_p6 = pnand %p1987_p5, %p1981_p2 }
 0xcc9   :  { %1991 = shalt.err (!%p1988_p6)
}
 0xcca   :  { %s1992_s11 = scalar_lea.hbm %s2328_s16, 32 }
 0xccb   :  { %p1993_p7 = scmp.ne.s32.totalorder %s2328_s16, %s1992_s11  ;;  %p1996_p8 = scmp.lt.u32.totalorder %s1992_s11, %s2328_s16 }
 0xccd   :  { %p1998_p9 = pnand %p1996_p8, %p1993_p7 }
 0xccf   :  { %2001 = shalt.err (!%p1998_p9)
}
 0xcd0   :  { %1487 = dma.vmem_to_hbm [thread:$0]  %s1485_s1, 32, %s2328_s16, [#allocation11]  }
 0xcd1   :  { %s2148_s0 = smov [#allocation9]  }
 0xcd2   :  { %s1474_s5 = sshll.u32 %s2148_s0, 4  ;;  %s1475_s5 = int_to_ptr.vmem [resolvable:$true] %s1474_s5 }
 0xcd3   :  { %s2002_s9 = scalar_lea.vmem %s1475_s5, 32  ;;  %p2007_p11 = scmp.lt.s32.totalorder %s1475_s5, %s1475_s5 }
 0xcd4   :  { %p2003_p10 = scmp.ne.s32.totalorder %s1475_s5, %s2002_s9  ;;  %p2008_p12 = scmp.lt.s32.totalorder %s2002_s9, %s2002_s9 }
 0xcd6   :  { %p2009_p13 = por %p2008_p12, %p2007_p11 }
 0xcd8   :  { %p2010_p0 = pnand %p2009_p13, %p2003_p10 }
 0xcda   :  { %2013 = shalt.err (!%p2010_p0)
}
 0xcdb   :  { %s2649_s13 = sld [smem:[#allocation38_spill]] }
 0xce1   :  { %s2014_s17 = scalar_lea.hbm %s2649_s13, 32 }
 0xce2   :  { %p2015_p1 = scmp.ne.s32.totalorder %s2649_s13, %s2014_s17  ;;  %p2018_p2 = scmp.lt.u32.totalorder %s2014_s17, %s2649_s13 }
 0xce4   :  { %p2020_p3 = pnand %p2018_p2, %p2015_p1 }
 0xce6   :  { %2023 = shalt.err (!%p2020_p3)
}
 0xce7   :  { %1477 = dma.vmem_to_hbm [thread:$0]  %s1475_s5, 32, %s2649_s13, [#allocation8]  }
 0xce8   :  { %s2149_s16 = smov [#allocation12]   ;;  %s2150_s19 = smov [#allocation13]  }
 0xce9   :  { %s1494_s3 = sshll.u32 %s2149_s16, 4  ;;  %s1506_s24 = sshll.u32 %s2150_s19, 4  ;;  %s1495_s3 = int_to_ptr.vmem [resolvable:$true] %s1494_s3  ;;  %s1507_s24 = int_to_ptr.vmem [resolvable:$true] %s1506_s24 }
 0xcea   :  { %s2024_s30 = scalar_lea.vmem %s1495_s3, 32  ;;  %p2029_p5 = scmp.lt.s32.totalorder %s1495_s3, %s1495_s3 }
 0xceb   :  { %p2025_p4 = scmp.ne.s32.totalorder %s1495_s3, %s2024_s30  ;;  %p2030_p6 = scmp.lt.s32.totalorder %s2024_s30, %s2024_s30 }
 0xced   :  { %p2031_p7 = por %p2030_p6, %p2029_p5 }
 0xcef   :  { %p2032_p8 = pnand %p2031_p7, %p2025_p4 }
 0xcf1   :  { %2035 = shalt.err (!%p2032_p8)
}
 0xcf2   :  { %s2036_s6 = scalar_lea.hbm %s2333_s22, 32 }
 0xcf3   :  { %p2037_p9 = scmp.ne.s32.totalorder %s2333_s22, %s2036_s6  ;;  %p2040_p10 = scmp.lt.u32.totalorder %s2036_s6, %s2333_s22 }
 0xcf5   :  { %p2042_p11 = pnand %p2040_p10, %p2037_p9 }
 0xcf7   :  { %2045 = shalt.err (!%p2042_p11)
}
 0xcf8   :  { %1497 = dma.vmem_to_hbm [thread:$0]  %s1495_s3, 32, %s2333_s22, [#allocation11]  }
 0xcf9   :  { %s2046_s12 = scalar_lea.vmem %s1507_s24, 32  ;;  %p2051_p13 = scmp.lt.s32.totalorder %s1507_s24, %s1507_s24 }
 0xcfa   :  { %p2047_p12 = scmp.ne.s32.totalorder %s1507_s24, %s2046_s12  ;;  %p2052_p0 = scmp.lt.s32.totalorder %s2046_s12, %s2046_s12 }
 0xcfc   :  { %p2053_p1 = por %p2052_p0, %p2051_p13 }
 0xcfe   :  { %p2054_p2 = pnand %p2053_p1, %p2047_p12 }
 0xd00   :  { %2057 = shalt.err (!%p2054_p2)
}
 0xd01   :  { %s2058_s20 = scalar_lea.hbm %s2343_s10, 32 }
 0xd02   :  { %p2059_p3 = scmp.ne.s32.totalorder %s2343_s10, %s2058_s20  ;;  %p2062_p4 = scmp.lt.u32.totalorder %s2058_s20, %s2343_s10 }
 0xd04   :  { %p2064_p5 = pnand %p2062_p4, %p2059_p3 }
 0xd06   :  { %2067 = shalt.err (!%p2064_p5)
}
 0xd07   :  { %1509 = dma.vmem_to_hbm [thread:$0]  %s1507_s24, 32, %s2343_s10, [#allocation14]   ;;  %v1387_v30 = vpop.permute.xlu1 %1386  ;;  %v1394_v55 = vpop.permute.xlu0 %1393  ;;  %vm1417_vm0 = vcmask 441344  }
 0xd08   :  { %vm1395_vm14 = vcmp.eq.s32.totalorder %v1387_v30, %v2371_v19  ;;  %vm1396_vm15 = vcmp.eq.s32.totalorder %v1394_v55, %v2371_v19  ;;  %s2151_s10 = smov [#allocation6]  }
 0xd09   :  { %v1598_v56 = vsel %vm1395_vm14, 1.0, %v2141_v9  ;;  %v1599_v59 = vsel %vm1396_vm15, 1.0, %v2141_v9  ;;  %s1454_s22 = sshll.u32 %s2151_s10, 4  ;;  %s1455_s22 = int_to_ptr.vmem [resolvable:$true] %s1454_s22 }
 0xd0a   :  { %s2068_s27 = scalar_lea.vmem %s1455_s22, 32  ;;  %p2073_p7 = scmp.lt.s32.totalorder %s1455_s22, %s1455_s22 }
 0xd0b   :  { %v1407_v57 = vpop.permute.xlu1 %1406  ;;  %v1414_v32 = vpop.permute.xlu0 %1413  ;;  %p2069_p6 = scmp.ne.s32.totalorder %s1455_s22, %s2068_s27  ;;  %p2074_p8 = scmp.lt.s32.totalorder %s2068_s27, %s2068_s27 }
 0xd0c   :  { %v1415_v60 = vmul.f32 %v1598_v56, %v1407_v57  ;;  %v1416_v61 = vmul.f32 %v1599_v59, %v1414_v32 }
 0xd0d   :  { %p2075_p9 = por %p2074_p8, %p2073_p7 }
 0xd0e   :  { %v1418_v16 = vsel %vm1417_vm0, %v1415_v60, 0.0  ;;  %v1425_v62 = vsel %vm1417_vm0, %v1416_v61, 0.0 }
 0xd0f   :  { %v1419_v63 = vrot.slane %v1418_v16, 4  ;;  %v1426_v0 = vrot.slane %v1425_v62, 4  ;;  %p2076_p10 = pnand %p2075_p9, %p2069_p6 }
 0xd11   :  { %v1420_v54 = vadd.f32 %v1419_v63, %v1418_v16  ;;  %v1427_v1 = vadd.f32 %v1426_v0, %v1425_v62 }
 0xd13   :  { %v1421_v3 = vrot.slane %v1420_v54, 2  ;;  %v1428_v5 = vrot.slane %v1427_v1, 2 }
 0xd15   :  { %v1422_v19 = vadd.f32 %v1421_v3, %v1420_v54  ;;  %v1429_v6 = vadd.f32 %v1428_v5, %v1427_v1 }
 0xd17   :  { %v1423_v7 = vrot.slane %v1422_v19, 1  ;;  %v1430_v8 = vrot.slane %v1429_v6, 1 }
 0xd19   :  { %v1424_v9 = vadd.f32 %v1423_v7, %v1422_v19  ;;  %v1431_v12 = vadd.f32 %v1430_v8, %v1429_v6 }
 0xd1b   :  { %v1434_v15 = vsel %vm869_vm8, %v1431_v12, %v1424_v9 }
 0xd2f   :  { %v1364_v4 = vpop.xlane.xlu1 %1363 }
 0xd30   :  { %1934 = vrcp.f32 %v1364_v4 }
 0xd33   :  { %v1370_v13 = vpop.permute.xlu1 %1369 }
 0xd3a   :  { %v1935_v10 = vpop.eup %1934 }
 0xd3b   :  { %v1366_v11 = vmul.f32 %v1935_v10, %v2570_v31 }
 0xd3d   :  { %v1372_v14 = vmul.f32 %v1370_v13, %v1366_v11 }
 0xd3f   :  { %v1436_v17 = vadd.f32 %v1434_v15, %v1372_v14 }
 0xd41   :  { %1437 = vst.msk [vmem:[#allocation6] sm:$0x3] %vm1355_vm13, %v1436_v17 }
 0xd42   :  { %2079 = shalt.err (!%p2076_p10)
}
 0xd43   :  { %s2650_s4 = sld [smem:[#allocation36_spill]] }
 0xd49   :  { %s2080_s25 = scalar_lea.hbm %s2650_s4, 32 }
 0xd4a   :  { %p2081_p11 = scmp.ne.s32.totalorder %s2650_s4, %s2080_s25  ;;  %p2084_p12 = scmp.lt.u32.totalorder %s2080_s25, %s2650_s4 }
 0xd4c   :  { %p2086_p13 = pnand %p2084_p12, %p2081_p11 }
 0xd4e   :  { %2089 = shalt.err (!%p2086_p13)
}
 0xd4f   :  { %1457 = dma.vmem_to_hbm [thread:$0]  %s1455_s22, 32, %s2650_s4, [#allocation5]  }
 0xd50   :  { %2092 = dma.done.wait [#allocation5], 32  }
 0xd51   :  { %2093 = vsyncadd [#allocation5], 4294967264 }
 0xd52   :  { %2094 = dma.done.wait [#allocation8], 64  }
 0xd53   :  { %2095 = vsyncadd [#allocation8], 4294967232 }
 0xd54   :  { %2096 = dma.done.wait [#allocation11], 64  }
 0xd55   :  { %2097 = vsyncadd [#allocation11], 4294967232 }
 0xd56   :  { %2098 = dma.done.wait [#allocation14], 32  }
 0xd57   :  { %2099 = vsyncadd [#allocation14], 4294967264 }
 0xd58   :  { %1530 = vsyncpa [#allocation4], 1 }
 0xd59   :  { %1531 = vsyncpa [#allocation5], 1 }
 0xd5a   :  { %1532 = vsyncpa [#allocation8], 1 }
 0xd5b   :  { %1533 = vsyncpa [#allocation11], 1 }
 0xd5c   :  { %1534 = vsyncpa [#allocation14], 1 }

</bundles_post_ra>
